<compile_context>
chip_gen: v6e
topology: v6e:2x2x1
jax: 0.10.0
libtpu: 0.0.40
codegen_flags: <defaults>
</compile_context>

<pallas_src>
import functools
import math

import jax
import jax.numpy as jnp
from jax import lax
from jax.experimental import pallas as pl
from jax.experimental.pallas import tpu as pltpu

EPS = 1e-5


# ----------------------------------------------------------------------------
# BlockSpec helpers
# ----------------------------------------------------------------------------
def _const_spec(shape):
    """Full-extent block, identical for every grid step (weights / BN vectors)."""
    zeros = (0,) * len(shape)
    return pl.BlockSpec(shape, lambda i, _z=zeros: _z)


# ----------------------------------------------------------------------------
# The fused whole-block kernel
# ----------------------------------------------------------------------------
def _make_dense_block_kernel(layer_dims, H, W):
    """Kernel processing ONE image per grid step, channel-major (C, H*W)."""
    M = H * W
    L = len(layer_dims)

    def shift_lanes(v, s):
        # result[:, p] = v[:, p + s] if 0 <= p + s < M else 0   (s is static)
        if s == 0:
            return v
        c = v.shape[0]
        pad = jnp.zeros((c, abs(s)), v.dtype)
        if s > 0:
            return jnp.concatenate([v[:, s:], pad], axis=1)
        return jnp.concatenate([pad, v[:, :s]], axis=1)

    def kernel(*refs):
        x_ref, o_ref, prm = refs[0], refs[-1], refs[1:-1]

        # lane index -> w coordinate; masks for horizontally shifted taps
        ww = lax.broadcasted_iota(jnp.int32, (1, M), 1) % W
        w_mask = {-1: ww >= 1, 0: None, 1: ww <= (W - 2)}

        cur = x_ref[0].astype(jnp.float32)                      # (C0, M)
        h2 = None
        for l, (cin, cout) in enumerate(layer_dims):
            s_in, b_in, w1, b1, w2, b2 = prm[6 * l:6 * l + 6]

            # pre-activation BatchNorm + ReLU (f32 prologue: v5e-safe)
            a = jnp.maximum(cur * s_in[...] + b_in[...], 0.0)
            a = a.astype(jnp.bfloat16)

            # 1x1 conv (BN scale pre-folded into w1) + BN bias + ReLU
            h1 = jnp.dot(w1[...], a, preferred_element_type=jnp.float32)
            h1 = jnp.maximum(h1 + b1[...], 0.0)
            h1b = h1.astype(jnp.bfloat16)

            # 3x3 conv, pad 1: nine lane-shifted, border-masked MXU taps
            # accumulated in f32 (no im2col, no HBM traffic).
            acc = jnp.zeros((cout, M), jnp.float32)
            for kh in range(3):
                for kw in range(3):
                    dy, dx = kh - 1, kw - 1
                    tap = shift_lanes(h1b, dy * W + dx)
                    if w_mask[dx] is not None:
                        tap = jnp.where(w_mask[dx], tap, jnp.zeros_like(tap))
                    acc = acc + jnp.dot(w2[kh * 3 + kw], tap,
                                        preferred_element_type=jnp.float32)
            h2 = acc + b2[...]                                   # conv2 bias

            if l + 1 < L:
                # torch.cat([out, x], dim=1): new channels first, VMEM-only
                cur = jnp.concatenate([h2, cur], axis=0)

        # Dense_block returns out[:, :out_channels] == the last layer's conv2
        o_ref[...] = h2[None].astype(o_ref.dtype)

    return kernel


# ----------------------------------------------------------------------------
# BN folding + forward wrapper
# ----------------------------------------------------------------------------
def bn_fold(bn):
    s = bn["gamma"] * lax.rsqrt(bn["var"] + EPS)
    return s, bn["beta"] - bn["mean"] * s


def dense_block_forward(x_nchw, layers, out_channels):
    """Forward pass of Dense_block; input and output are NCHW."""
    N, C0, H, W = x_nchw.shape
    M = H * W

    args = [x_nchw.reshape(N, C0, M).astype(jnp.float32)]
    in_specs = [pl.BlockSpec((1, C0, M), lambda i: (i, 0, 0))]
    layer_dims = []
    for p in layers:
        cout, cin = p["conv1_w"].shape[:2]
        layer_dims.append((cin, cout))
        s_in, b_in = bn_fold(p["bn"])            # pre-activation BN
        s1, b1 = bn_fold(p["conv1_bn"])          # BN after the 1x1 conv
        w1 = (p["conv1_w"].reshape(cout, cin) * s1[:, None]).astype(jnp.bfloat16)
        w2 = jnp.transpose(p["conv2_w"], (2, 3, 0, 1)).reshape(9, cout, cout)
        lay = (s_in.reshape(cin, 1).astype(jnp.float32),
               b_in.reshape(cin, 1).astype(jnp.float32),
               w1,
               b1.reshape(cout, 1).astype(jnp.float32),
               w2.astype(jnp.bfloat16),
               p["conv2_b"].reshape(cout, 1).astype(jnp.float32))
        args.extend(lay)
        in_specs.extend(_const_spec(a.shape) for a in lay)

    cout_last = layer_dims[-1][1]
    assert cout_last == out_channels

    out = pl.pallas_call(
        _make_dense_block_kernel(tuple(layer_dims), H, W),
        out_shape=jax.ShapeDtypeStruct((N, cout_last, M), jnp.float32),
        grid_spec=pltpu.PrefetchScalarGridSpec(
            num_scalar_prefetch=0,
            grid=(N,),                     # one image per step; 2 steps here
            in_specs=in_specs,
            out_specs=pl.BlockSpec((1, cout_last, M), lambda i: (i, 0, 0)),
        ),
        compiler_params=pltpu.CompilerParams(
            dimension_semantics=("parallel",),
            vmem_limit_bytes=32 * 1024 * 1024),
    )(*args)
    return out.reshape(N, cout_last, H, W)


# ----------------------------------------------------------------------------
# Parameter init (mirrors the PyTorch module's shapes; deterministic)
# ----------------------------------------------------------------------------
def _bf16_round(w):
    # Round through bf16 so the Pallas (bf16-operand) path and the f32
    # reference see identical weight/input values.
    return w.astype(jnp.bfloat16).astype(jnp.float32)


def make_bn(key, c):
    # Non-trivial (inference-mode) BN statistics so the folding path is
    # actually exercised by the self-check.
    k1, k2, k3, k4 = jax.random.split(key, 4)
    return {"gamma": jax.random.uniform(k1, (c,), jnp.float32, 0.8, 1.2),
            "beta": 0.1 * jax.random.normal(k2, (c,), jnp.float32),
            "mean": 0.1 * jax.random.normal(k3, (c,), jnp.float32),
            "var": jax.random.uniform(k4, (c,), jnp.float32, 0.6, 1.4)}


def kaiming_conv(key, co, ci, kh, kw):
    std = (2.0 / (ci * kh * kw)) ** 0.5
    return _bf16_round(std * jax.random.normal(key, (co, ci, kh, kw), jnp.float32))


def init_dense_block(key, in_channels, out_channels, block_scale):
    layers = []
    for i in range(block_scale):
        cin = in_channels + i * out_channels
        key, k1, k2, k3, k4, k5 = jax.random.split(key, 6)
        bound = 1.0 / math.sqrt(out_channels * 3 * 3)   # PyTorch conv bias init
        layers.append({
            "bn": make_bn(k1, cin),
            "conv1_w": kaiming_conv(k2, out_channels, cin, 1, 1),
            "conv1_bn": make_bn(k3, out_channels),
            "conv2_w": kaiming_conv(k4, out_channels, out_channels, 3, 3),
            "conv2_b": jax.random.uniform(k5, (out_channels,), jnp.float32,
                                          -bound, bound),
        })
    return layers


# ----------------------------------------------------------------------------
# Pure-JAX f32 reference for correctness checking
# ----------------------------------------------------------------------------
def _conv2d_ref(x, w_oihw, stride, padding, bias=None):
    y = lax.conv_general_dilated(
        x, w_oihw, (stride, stride),
        [(padding, padding), (padding, padding)],
        dimension_numbers=("NCHW", "OIHW", "NCHW"))
    return y if bias is None else y + bias[None, :, None, None]


def _bn_ref(x, bn):
    s, b = bn_fold(bn)
    return x * s[None, :, None, None] + b[None, :, None, None]


def dense_block_ref(x, layers, out_channels):
    x = x.astype(jnp.float32)
    for p in layers:
        h = jax.nn.relu(_bn_ref(x, p["bn"]))
        h = jax.nn.relu(_bn_ref(_conv2d_ref(h, p["conv1_w"], 1, 0),
                                p["conv1_bn"]))
        h = _conv2d_ref(h, p["conv2_w"], 1, 1, bias=p["conv2_b"])
        x = jnp.concatenate([h, x], axis=1)
    return x[:, :out_channels]


# ----------------------------------------------------------------------------
if __name__ == "__main__":
    batch, in_channels, hw = 2, 16, 16
    out_channels = 16            # growth rate
    block_scale = 3

    key = jax.random.PRNGKey(0)
    pkey, xkey = jax.random.split(key)
    params = init_dense_block(pkey, in_channels, out_channels, block_scale)

    x = jax.random.normal(xkey, (batch, in_channels, hw, hw), jnp.float32)
    x = _bf16_round(x)           # same values for the bf16 MXU path & f32 ref

    fwd = jax.jit(functools.partial(dense_block_forward,
                                    out_channels=out_channels))
    out = fwd(x, params)
    jax.block_until_ready(out)

    assert out.shape == (batch, out_channels, hw, hw), out.shape
    assert bool(jnp.all(jnp.isfinite(out)))

    # Correctness vs f32 reference (tolerance covers bf16 MXU operands).
    ref = dense_block_ref(x, params, out_channels)
    err = float(jnp.max(jnp.abs(out - ref)))
    tol = 0.05 * float(jnp.max(jnp.abs(ref))) + 0.05
    assert err <= tol, (err, tol)

    print("KERNEL_OK")
</pallas_src>

<mosaic_0001>
module attributes {stable_mosaic.version = 11 : i64} {
  func.func @kernel(%arg0: i32, %arg1: memref<1x16x256xf32, #tpu.memory_space<vmem>>, %arg2: memref<16x1xf32, #tpu.memory_space<vmem>>, %arg3: memref<16x1xf32, #tpu.memory_space<vmem>>, %arg4: memref<16x16xbf16, #tpu.memory_space<vmem>>, %arg5: memref<16x1xf32, #tpu.memory_space<vmem>>, %arg6: memref<9x16x16xbf16, #tpu.memory_space<vmem>>, %arg7: memref<16x1xf32, #tpu.memory_space<vmem>>, %arg8: memref<32x1xf32, #tpu.memory_space<vmem>>, %arg9: memref<32x1xf32, #tpu.memory_space<vmem>>, %arg10: memref<16x32xbf16, #tpu.memory_space<vmem>>, %arg11: memref<16x1xf32, #tpu.memory_space<vmem>>, %arg12: memref<9x16x16xbf16, #tpu.memory_space<vmem>>, %arg13: memref<16x1xf32, #tpu.memory_space<vmem>>, %arg14: memref<48x1xf32, #tpu.memory_space<vmem>>, %arg15: memref<48x1xf32, #tpu.memory_space<vmem>>, %arg16: memref<16x48xbf16, #tpu.memory_space<vmem>>, %arg17: memref<16x1xf32, #tpu.memory_space<vmem>>, %arg18: memref<9x16x16xbf16, #tpu.memory_space<vmem>>, %arg19: memref<16x1xf32, #tpu.memory_space<vmem>>, %arg20: memref<1x16x256xf32, #tpu.memory_space<vmem>>) attributes {dimension_semantics = [#tpu.dimension_semantics<parallel>], iteration_bounds = array<i64: 2>, scalar_prefetch = 0 : i64, scratch_operands = 0 : i64, tpu.core_type = #tpu.core_type<tc>, window_params = [{transform_indices = @transform_0, window_bounds = array<i64: 1, 16, 256>}, {pipeline_mode = #tpu.pipeline_mode<synchronous>, transform_indices = @transform_1, window_bounds = array<i64: 16, 1>}, {pipeline_mode = #tpu.pipeline_mode<synchronous>, transform_indices = @transform_2, window_bounds = array<i64: 16, 1>}, {pipeline_mode = #tpu.pipeline_mode<synchronous>, transform_indices = @transform_3, window_bounds = array<i64: 16, 16>}, {pipeline_mode = #tpu.pipeline_mode<synchronous>, transform_indices = @transform_4, window_bounds = array<i64: 16, 1>}, {pipeline_mode = #tpu.pipeline_mode<synchronous>, transform_indices = @transform_5, window_bounds = array<i64: 9, 16, 16>}, {pipeline_mode = #tpu.pipeline_mode<synchronous>, transform_indices = @transform_6, window_bounds = array<i64: 16, 1>}, {pipeline_mode = #tpu.pipeline_mode<synchronous>, transform_indices = @transform_7, window_bounds = array<i64: 32, 1>}, {pipeline_mode = #tpu.pipeline_mode<synchronous>, transform_indices = @transform_8, window_bounds = array<i64: 32, 1>}, {pipeline_mode = #tpu.pipeline_mode<synchronous>, transform_indices = @transform_9, window_bounds = array<i64: 16, 32>}, {pipeline_mode = #tpu.pipeline_mode<synchronous>, transform_indices = @transform_10, window_bounds = array<i64: 16, 1>}, {pipeline_mode = #tpu.pipeline_mode<synchronous>, transform_indices = @transform_11, window_bounds = array<i64: 9, 16, 16>}, {pipeline_mode = #tpu.pipeline_mode<synchronous>, transform_indices = @transform_12, window_bounds = array<i64: 16, 1>}, {pipeline_mode = #tpu.pipeline_mode<synchronous>, transform_indices = @transform_13, window_bounds = array<i64: 48, 1>}, {pipeline_mode = #tpu.pipeline_mode<synchronous>, transform_indices = @transform_14, window_bounds = array<i64: 48, 1>}, {pipeline_mode = #tpu.pipeline_mode<synchronous>, transform_indices = @transform_15, window_bounds = array<i64: 16, 48>}, {pipeline_mode = #tpu.pipeline_mode<synchronous>, transform_indices = @transform_16, window_bounds = array<i64: 16, 1>}, {pipeline_mode = #tpu.pipeline_mode<synchronous>, transform_indices = @transform_17, window_bounds = array<i64: 9, 16, 16>}, {pipeline_mode = #tpu.pipeline_mode<synchronous>, transform_indices = @transform_18, window_bounds = array<i64: 16, 1>}, {transform_indices = @transform_19, window_bounds = array<i64: 1, 16, 256>}]} {
    %0 = tpu.iota {dimensions = array<i32: 1>} : vector<1x256xi32>
    %c16_i32 = arith.constant 16 : i32
    %c0_i32 = arith.constant 0 : i32
    %1 = arith.cmpi eq, %c16_i32, %c0_i32 : i32
    %c1_i32 = arith.constant 1 : i32
    %2 = arith.select %1, %c1_i32, %c16_i32 : i32
    %3 = vector.broadcast %2 : i32 to vector<1x256xi32>
    %4 = arith.remsi %0, %3 : vector<1x256xi32>
    %c0_i32_0 = arith.constant 0 : i32
    %5 = vector.broadcast %c0_i32_0 : i32 to vector<1x256xi32>
    %6 = arith.cmpi ne, %4, %5 : vector<1x256xi32>
    %c0_i32_1 = arith.constant 0 : i32
    %7 = vector.broadcast %c0_i32_1 : i32 to vector<1x256xi32>
    %8 = arith.cmpi slt, %4, %7 : vector<1x256xi32>
    %c0_i32_2 = arith.constant 0 : i32
    %9 = arith.cmpi slt, %2, %c0_i32_2 : i32
    %10 = vector.broadcast %9 : i1 to vector<1x256xi1>
    %11 = vector.broadcast %10 : vector<1x256xi1> to vector<1x256xi1>
    %12 = arith.xori %8, %11 : vector<1x256xi1>
    %13 = arith.andi %12, %6 : vector<1x256xi1>
    %14 = vector.broadcast %2 : i32 to vector<1x256xi32>
    %15 = arith.addi %4, %14 : vector<1x256xi32>
    %16 = arith.select %13, %15, %4 : vector<1x256xi1>, vector<1x256xi32>
    %c1_i32_3 = arith.constant 1 : i32
    %17 = vector.broadcast %c1_i32_3 : i32 to vector<1x256xi32>
    %18 = arith.cmpi sge, %16, %17 : vector<1x256xi32>
    %c14_i32 = arith.constant 14 : i32
    %19 = vector.broadcast %c14_i32 : i32 to vector<1x256xi32>
    %20 = arith.cmpi sle, %16, %19 : vector<1x256xi32>
    %c0 = arith.constant 0 : index
    %c0_4 = arith.constant 0 : index
    %c0_5 = arith.constant 0 : index
    %21 = vector.load %arg1[%c0, %c0_4, %c0_5] : memref<1x16x256xf32, #tpu.memory_space<vmem>>, vector<1x16x256xf32>
    %22 = vector.shape_cast %21 : vector<1x16x256xf32> to vector<16x256xf32>
    %c0_6 = arith.constant 0 : index
    %c0_7 = arith.constant 0 : index
    %23 = vector.load %arg2[%c0_6, %c0_7] : memref<16x1xf32, #tpu.memory_space<vmem>>, vector<16x1xf32>
    %24 = vector.broadcast %23 : vector<16x1xf32> to vector<16x256xf32>
    %25 = arith.mulf %22, %24 : vector<16x256xf32>
    %c0_8 = arith.constant 0 : index
    %c0_9 = arith.constant 0 : index
    %26 = vector.load %arg3[%c0_8, %c0_9] : memref<16x1xf32, #tpu.memory_space<vmem>>, vector<16x1xf32>
    %27 = vector.broadcast %26 : vector<16x1xf32> to vector<16x256xf32>
    %28 = arith.addf %25, %27 : vector<16x256xf32>
    %cst = arith.constant 0.000000e+00 : f32
    %29 = vector.broadcast %cst : f32 to vector<16x256xf32>
    %30 = arith.maximumf %28, %29 : vector<16x256xf32>
    %31 = arith.truncf %30 : vector<16x256xf32> to vector<16x256xbf16>
    %c0_10 = arith.constant 0 : index
    %c0_11 = arith.constant 0 : index
    %32 = vector.load %arg4[%c0_10, %c0_11] : memref<16x16xbf16, #tpu.memory_space<vmem>>, vector<16x16xbf16>
    %cst_12 = arith.constant dense<0.000000e+00> : vector<16x256xf32>
    %33 = tpu.matmul %32, %31, %cst_12 {dimension_numbers = #tpu.dot_dimension_numbers<[1], [0], [0], [1], [0, 0, 1, 1], [], []>} : vector<16x16xbf16>, vector<16x256xbf16>, vector<16x256xf32> -> vector<16x256xf32>
    %c0_13 = arith.constant 0 : index
    %c0_14 = arith.constant 0 : index
    %34 = vector.load %arg5[%c0_13, %c0_14] : memref<16x1xf32, #tpu.memory_space<vmem>>, vector<16x1xf32>
    %35 = vector.broadcast %34 : vector<16x1xf32> to vector<16x256xf32>
    %36 = arith.addf %33, %35 : vector<16x256xf32>
    %cst_15 = arith.constant 0.000000e+00 : f32
    %37 = vector.broadcast %cst_15 : f32 to vector<16x256xf32>
    %38 = arith.maximumf %36, %37 : vector<16x256xf32>
    %39 = arith.truncf %38 : vector<16x256xf32> to vector<16x256xbf16>
    %cst_16 = arith.constant 0.000000e+00 : f32
    %40 = vector.broadcast %cst_16 : f32 to vector<16x256xf32>
    %cst_17 = arith.constant 0.000000e+00 : bf16
    %41 = vector.broadcast %cst_17 : bf16 to vector<16x17xbf16>
    %42 = vector.extract_strided_slice %39 {offsets = [0, 0], sizes = [16, 239], strides = [1, 1]} : vector<16x256xbf16> to vector<16x239xbf16>
    %43 = tpu.concatenate %41, %42 in 1 : vector<16x17xbf16>, vector<16x239xbf16> -> vector<16x256xbf16>
    %cst_18 = arith.constant 0.000000e+00 : bf16
    %44 = vector.broadcast %cst_18 : bf16 to vector<16x256xbf16>
    %45 = vector.shape_cast %18 : vector<1x256xi1> to vector<1x256xi1>
    %46 = vector.broadcast %45 : vector<1x256xi1> to vector<16x256xi1>
    %47 = arith.select %46, %43, %44 : vector<16x256xi1>, vector<16x256xbf16>
    %c0_19 = arith.constant 0 : index
    %c0_20 = arith.constant 0 : index
    %c0_21 = arith.constant 0 : index
    %48 = vector.load %arg6[%c0_19, %c0_20, %c0_21] : memref<9x16x16xbf16, #tpu.memory_space<vmem>>, vector<1x16x16xbf16>
    %49 = vector.shape_cast %48 : vector<1x16x16xbf16> to vector<16x16xbf16>
    %cst_22 = arith.constant dense<0.000000e+00> : vector<16x256xf32>
    %50 = tpu.matmul %49, %47, %cst_22 {dimension_numbers = #tpu.dot_dimension_numbers<[1], [0], [0], [1], [0, 0, 1, 1], [], []>} : vector<16x16xbf16>, vector<16x256xbf16>, vector<16x256xf32> -> vector<16x256xf32>
    %51 = arith.addf %40, %50 : vector<16x256xf32>
    %cst_23 = arith.constant 0.000000e+00 : bf16
    %52 = vector.broadcast %cst_23 : bf16 to vector<16x16xbf16>
    %53 = vector.extract_strided_slice %39 {offsets = [0, 0], sizes = [16, 240], strides = [1, 1]} : vector<16x256xbf16> to vector<16x240xbf16>
    %54 = tpu.concatenate %52, %53 in 1 : vector<16x16xbf16>, vector<16x240xbf16> -> vector<16x256xbf16>
    %c1 = arith.constant 1 : index
    %c0_24 = arith.constant 0 : index
    %c0_25 = arith.constant 0 : index
    %55 = vector.load %arg6[%c1, %c0_24, %c0_25] : memref<9x16x16xbf16, #tpu.memory_space<vmem>>, vector<1x16x16xbf16>
    %56 = vector.shape_cast %55 : vector<1x16x16xbf16> to vector<16x16xbf16>
    %cst_26 = arith.constant dense<0.000000e+00> : vector<16x256xf32>
    %57 = tpu.matmul %56, %54, %cst_26 {dimension_numbers = #tpu.dot_dimension_numbers<[1], [0], [0], [1], [0, 0, 1, 1], [], []>} : vector<16x16xbf16>, vector<16x256xbf16>, vector<16x256xf32> -> vector<16x256xf32>
    %58 = arith.addf %51, %57 : vector<16x256xf32>
    %cst_27 = arith.constant 0.000000e+00 : bf16
    %59 = vector.broadcast %cst_27 : bf16 to vector<16x15xbf16>
    %60 = vector.extract_strided_slice %39 {offsets = [0, 0], sizes = [16, 241], strides = [1, 1]} : vector<16x256xbf16> to vector<16x241xbf16>
    %61 = tpu.concatenate %59, %60 in 1 : vector<16x15xbf16>, vector<16x241xbf16> -> vector<16x256xbf16>
    %cst_28 = arith.constant 0.000000e+00 : bf16
    %62 = vector.broadcast %cst_28 : bf16 to vector<16x256xbf16>
    %63 = vector.shape_cast %20 : vector<1x256xi1> to vector<1x256xi1>
    %64 = vector.broadcast %63 : vector<1x256xi1> to vector<16x256xi1>
    %65 = arith.select %64, %61, %62 : vector<16x256xi1>, vector<16x256xbf16>
    %c2 = arith.constant 2 : index
    %c0_29 = arith.constant 0 : index
    %c0_30 = arith.constant 0 : index
    %66 = vector.load %arg6[%c2, %c0_29, %c0_30] : memref<9x16x16xbf16, #tpu.memory_space<vmem>>, vector<1x16x16xbf16>
    %67 = vector.shape_cast %66 : vector<1x16x16xbf16> to vector<16x16xbf16>
    %cst_31 = arith.constant dense<0.000000e+00> : vector<16x256xf32>
    %68 = tpu.matmul %67, %65, %cst_31 {dimension_numbers = #tpu.dot_dimension_numbers<[1], [0], [0], [1], [0, 0, 1, 1], [], []>} : vector<16x16xbf16>, vector<16x256xbf16>, vector<16x256xf32> -> vector<16x256xf32>
    %69 = arith.addf %58, %68 : vector<16x256xf32>
    %cst_32 = arith.constant 0.000000e+00 : bf16
    %70 = vector.broadcast %cst_32 : bf16 to vector<16x1xbf16>
    %71 = vector.extract_strided_slice %39 {offsets = [0, 0], sizes = [16, 255], strides = [1, 1]} : vector<16x256xbf16> to vector<16x255xbf16>
    %72 = tpu.concatenate %70, %71 in 1 : vector<16x1xbf16>, vector<16x255xbf16> -> vector<16x256xbf16>
    %cst_33 = arith.constant 0.000000e+00 : bf16
    %73 = vector.broadcast %cst_33 : bf16 to vector<16x256xbf16>
    %74 = vector.shape_cast %18 : vector<1x256xi1> to vector<1x256xi1>
    %75 = vector.broadcast %74 : vector<1x256xi1> to vector<16x256xi1>
    %76 = arith.select %75, %72, %73 : vector<16x256xi1>, vector<16x256xbf16>
    %c3 = arith.constant 3 : index
    %c0_34 = arith.constant 0 : index
    %c0_35 = arith.constant 0 : index
    %77 = vector.load %arg6[%c3, %c0_34, %c0_35] : memref<9x16x16xbf16, #tpu.memory_space<vmem>>, vector<1x16x16xbf16>
    %78 = vector.shape_cast %77 : vector<1x16x16xbf16> to vector<16x16xbf16>
    %cst_36 = arith.constant dense<0.000000e+00> : vector<16x256xf32>
    %79 = tpu.matmul %78, %76, %cst_36 {dimension_numbers = #tpu.dot_dimension_numbers<[1], [0], [0], [1], [0, 0, 1, 1], [], []>} : vector<16x16xbf16>, vector<16x256xbf16>, vector<16x256xf32> -> vector<16x256xf32>
    %80 = arith.addf %69, %79 : vector<16x256xf32>
    %c4 = arith.constant 4 : index
    %c0_37 = arith.constant 0 : index
    %c0_38 = arith.constant 0 : index
    %81 = vector.load %arg6[%c4, %c0_37, %c0_38] : memref<9x16x16xbf16, #tpu.memory_space<vmem>>, vector<1x16x16xbf16>
    %82 = vector.shape_cast %81 : vector<1x16x16xbf16> to vector<16x16xbf16>
    %cst_39 = arith.constant dense<0.000000e+00> : vector<16x256xf32>
    %83 = tpu.matmul %82, %39, %cst_39 {dimension_numbers = #tpu.dot_dimension_numbers<[1], [0], [0], [1], [0, 0, 1, 1], [], []>} : vector<16x16xbf16>, vector<16x256xbf16>, vector<16x256xf32> -> vector<16x256xf32>
    %84 = arith.addf %80, %83 : vector<16x256xf32>
    %cst_40 = arith.constant 0.000000e+00 : bf16
    %85 = vector.broadcast %cst_40 : bf16 to vector<16x1xbf16>
    %86 = vector.extract_strided_slice %39 {offsets = [0, 1], sizes = [16, 255], strides = [1, 1]} : vector<16x256xbf16> to vector<16x255xbf16>
    %87 = tpu.concatenate %86, %85 in 1 : vector<16x255xbf16>, vector<16x1xbf16> -> vector<16x256xbf16>
    %cst_41 = arith.constant 0.000000e+00 : bf16
    %88 = vector.broadcast %cst_41 : bf16 to vector<16x256xbf16>
    %89 = vector.shape_cast %20 : vector<1x256xi1> to vector<1x256xi1>
    %90 = vector.broadcast %89 : vector<1x256xi1> to vector<16x256xi1>
    %91 = arith.select %90, %87, %88 : vector<16x256xi1>, vector<16x256xbf16>
    %c5 = arith.constant 5 : index
    %c0_42 = arith.constant 0 : index
    %c0_43 = arith.constant 0 : index
    %92 = vector.load %arg6[%c5, %c0_42, %c0_43] : memref<9x16x16xbf16, #tpu.memory_space<vmem>>, vector<1x16x16xbf16>
    %93 = vector.shape_cast %92 : vector<1x16x16xbf16> to vector<16x16xbf16>
    %cst_44 = arith.constant dense<0.000000e+00> : vector<16x256xf32>
    %94 = tpu.matmul %93, %91, %cst_44 {dimension_numbers = #tpu.dot_dimension_numbers<[1], [0], [0], [1], [0, 0, 1, 1], [], []>} : vector<16x16xbf16>, vector<16x256xbf16>, vector<16x256xf32> -> vector<16x256xf32>
    %95 = arith.addf %84, %94 : vector<16x256xf32>
    %cst_45 = arith.constant 0.000000e+00 : bf16
    %96 = vector.broadcast %cst_45 : bf16 to vector<16x15xbf16>
    %97 = vector.extract_strided_slice %39 {offsets = [0, 15], sizes = [16, 241], strides = [1, 1]} : vector<16x256xbf16> to vector<16x241xbf16>
    %98 = tpu.concatenate %97, %96 in 1 : vector<16x241xbf16>, vector<16x15xbf16> -> vector<16x256xbf16>
    %cst_46 = arith.constant 0.000000e+00 : bf16
    %99 = vector.broadcast %cst_46 : bf16 to vector<16x256xbf16>
    %100 = vector.shape_cast %18 : vector<1x256xi1> to vector<1x256xi1>
    %101 = vector.broadcast %100 : vector<1x256xi1> to vector<16x256xi1>
    %102 = arith.select %101, %98, %99 : vector<16x256xi1>, vector<16x256xbf16>
    %c6 = arith.constant 6 : index
    %c0_47 = arith.constant 0 : index
    %c0_48 = arith.constant 0 : index
    %103 = vector.load %arg6[%c6, %c0_47, %c0_48] : memref<9x16x16xbf16, #tpu.memory_space<vmem>>, vector<1x16x16xbf16>
    %104 = vector.shape_cast %103 : vector<1x16x16xbf16> to vector<16x16xbf16>
    %cst_49 = arith.constant dense<0.000000e+00> : vector<16x256xf32>
    %105 = tpu.matmul %104, %102, %cst_49 {dimension_numbers = #tpu.dot_dimension_numbers<[1], [0], [0], [1], [0, 0, 1, 1], [], []>} : vector<16x16xbf16>, vector<16x256xbf16>, vector<16x256xf32> -> vector<16x256xf32>
    %106 = arith.addf %95, %105 : vector<16x256xf32>
    %cst_50 = arith.constant 0.000000e+00 : bf16
    %107 = vector.broadcast %cst_50 : bf16 to vector<16x16xbf16>
    %108 = vector.extract_strided_slice %39 {offsets = [0, 16], sizes = [16, 240], strides = [1, 1]} : vector<16x256xbf16> to vector<16x240xbf16>
    %109 = tpu.concatenate %108, %107 in 1 : vector<16x240xbf16>, vector<16x16xbf16> -> vector<16x256xbf16>
    %c7 = arith.constant 7 : index
    %c0_51 = arith.constant 0 : index
    %c0_52 = arith.constant 0 : index
    %110 = vector.load %arg6[%c7, %c0_51, %c0_52] : memref<9x16x16xbf16, #tpu.memory_space<vmem>>, vector<1x16x16xbf16>
    %111 = vector.shape_cast %110 : vector<1x16x16xbf16> to vector<16x16xbf16>
    %cst_53 = arith.constant dense<0.000000e+00> : vector<16x256xf32>
    %112 = tpu.matmul %111, %109, %cst_53 {dimension_numbers = #tpu.dot_dimension_numbers<[1], [0], [0], [1], [0, 0, 1, 1], [], []>} : vector<16x16xbf16>, vector<16x256xbf16>, vector<16x256xf32> -> vector<16x256xf32>
    %113 = arith.addf %106, %112 : vector<16x256xf32>
    %cst_54 = arith.constant 0.000000e+00 : bf16
    %114 = vector.broadcast %cst_54 : bf16 to vector<16x17xbf16>
    %115 = vector.extract_strided_slice %39 {offsets = [0, 17], sizes = [16, 239], strides = [1, 1]} : vector<16x256xbf16> to vector<16x239xbf16>
    %116 = tpu.concatenate %115, %114 in 1 : vector<16x239xbf16>, vector<16x17xbf16> -> vector<16x256xbf16>
    %cst_55 = arith.constant 0.000000e+00 : bf16
    %117 = vector.broadcast %cst_55 : bf16 to vector<16x256xbf16>
    %118 = vector.shape_cast %20 : vector<1x256xi1> to vector<1x256xi1>
    %119 = vector.broadcast %118 : vector<1x256xi1> to vector<16x256xi1>
    %120 = arith.select %119, %116, %117 : vector<16x256xi1>, vector<16x256xbf16>
    %c8 = arith.constant 8 : index
    %c0_56 = arith.constant 0 : index
    %c0_57 = arith.constant 0 : index
    %121 = vector.load %arg6[%c8, %c0_56, %c0_57] : memref<9x16x16xbf16, #tpu.memory_space<vmem>>, vector<1x16x16xbf16>
    %122 = vector.shape_cast %121 : vector<1x16x16xbf16> to vector<16x16xbf16>
    %cst_58 = arith.constant dense<0.000000e+00> : vector<16x256xf32>
    %123 = tpu.matmul %122, %120, %cst_58 {dimension_numbers = #tpu.dot_dimension_numbers<[1], [0], [0], [1], [0, 0, 1, 1], [], []>} : vector<16x16xbf16>, vector<16x256xbf16>, vector<16x256xf32> -> vector<16x256xf32>
    %124 = arith.addf %113, %123 : vector<16x256xf32>
    %c0_59 = arith.constant 0 : index
    %c0_60 = arith.constant 0 : index
    %125 = vector.load %arg7[%c0_59, %c0_60] : memref<16x1xf32, #tpu.memory_space<vmem>>, vector<16x1xf32>
    %126 = vector.broadcast %125 : vector<16x1xf32> to vector<16x256xf32>
    %127 = arith.addf %124, %126 : vector<16x256xf32>
    %128 = tpu.concatenate %127, %22 in 0 : vector<16x256xf32>, vector<16x256xf32> -> vector<32x256xf32>
    %c0_61 = arith.constant 0 : index
    %c0_62 = arith.constant 0 : index
    %129 = vector.load %arg8[%c0_61, %c0_62] : memref<32x1xf32, #tpu.memory_space<vmem>>, vector<32x1xf32>
    %130 = vector.broadcast %129 : vector<32x1xf32> to vector<32x256xf32>
    %131 = arith.mulf %128, %130 : vector<32x256xf32>
    %c0_63 = arith.constant 0 : index
    %c0_64 = arith.constant 0 : index
    %132 = vector.load %arg9[%c0_63, %c0_64] : memref<32x1xf32, #tpu.memory_space<vmem>>, vector<32x1xf32>
    %133 = vector.broadcast %132 : vector<32x1xf32> to vector<32x256xf32>
    %134 = arith.addf %131, %133 : vector<32x256xf32>
    %cst_65 = arith.constant 0.000000e+00 : f32
    %135 = vector.broadcast %cst_65 : f32 to vector<32x256xf32>
    %136 = arith.maximumf %134, %135 : vector<32x256xf32>
    %137 = arith.truncf %136 : vector<32x256xf32> to vector<32x256xbf16>
    %c0_66 = arith.constant 0 : index
    %c0_67 = arith.constant 0 : index
    %138 = vector.load %arg10[%c0_66, %c0_67] : memref<16x32xbf16, #tpu.memory_space<vmem>>, vector<16x32xbf16>
    %cst_68 = arith.constant dense<0.000000e+00> : vector<16x256xf32>
    %139 = tpu.matmul %138, %137, %cst_68 {dimension_numbers = #tpu.dot_dimension_numbers<[1], [0], [0], [1], [0, 0, 1, 1], [], []>} : vector<16x32xbf16>, vector<32x256xbf16>, vector<16x256xf32> -> vector<16x256xf32>
    %c0_69 = arith.constant 0 : index
    %c0_70 = arith.constant 0 : index
    %140 = vector.load %arg11[%c0_69, %c0_70] : memref<16x1xf32, #tpu.memory_space<vmem>>, vector<16x1xf32>
    %141 = vector.broadcast %140 : vector<16x1xf32> to vector<16x256xf32>
    %142 = arith.addf %139, %141 : vector<16x256xf32>
    %cst_71 = arith.constant 0.000000e+00 : f32
    %143 = vector.broadcast %cst_71 : f32 to vector<16x256xf32>
    %144 = arith.maximumf %142, %143 : vector<16x256xf32>
    %145 = arith.truncf %144 : vector<16x256xf32> to vector<16x256xbf16>
    %cst_72 = arith.constant 0.000000e+00 : f32
    %146 = vector.broadcast %cst_72 : f32 to vector<16x256xf32>
    %cst_73 = arith.constant 0.000000e+00 : bf16
    %147 = vector.broadcast %cst_73 : bf16 to vector<16x17xbf16>
    %148 = vector.extract_strided_slice %145 {offsets = [0, 0], sizes = [16, 239], strides = [1, 1]} : vector<16x256xbf16> to vector<16x239xbf16>
    %149 = tpu.concatenate %147, %148 in 1 : vector<16x17xbf16>, vector<16x239xbf16> -> vector<16x256xbf16>
    %cst_74 = arith.constant 0.000000e+00 : bf16
    %150 = vector.broadcast %cst_74 : bf16 to vector<16x256xbf16>
    %151 = vector.shape_cast %18 : vector<1x256xi1> to vector<1x256xi1>
    %152 = vector.broadcast %151 : vector<1x256xi1> to vector<16x256xi1>
    %153 = arith.select %152, %149, %150 : vector<16x256xi1>, vector<16x256xbf16>
    %c0_75 = arith.constant 0 : index
    %c0_76 = arith.constant 0 : index
    %c0_77 = arith.constant 0 : index
    %154 = vector.load %arg12[%c0_75, %c0_76, %c0_77] : memref<9x16x16xbf16, #tpu.memory_space<vmem>>, vector<1x16x16xbf16>
    %155 = vector.shape_cast %154 : vector<1x16x16xbf16> to vector<16x16xbf16>
    %cst_78 = arith.constant dense<0.000000e+00> : vector<16x256xf32>
    %156 = tpu.matmul %155, %153, %cst_78 {dimension_numbers = #tpu.dot_dimension_numbers<[1], [0], [0], [1], [0, 0, 1, 1], [], []>} : vector<16x16xbf16>, vector<16x256xbf16>, vector<16x256xf32> -> vector<16x256xf32>
    %157 = arith.addf %146, %156 : vector<16x256xf32>
    %cst_79 = arith.constant 0.000000e+00 : bf16
    %158 = vector.broadcast %cst_79 : bf16 to vector<16x16xbf16>
    %159 = vector.extract_strided_slice %145 {offsets = [0, 0], sizes = [16, 240], strides = [1, 1]} : vector<16x256xbf16> to vector<16x240xbf16>
    %160 = tpu.concatenate %158, %159 in 1 : vector<16x16xbf16>, vector<16x240xbf16> -> vector<16x256xbf16>
    %c1_80 = arith.constant 1 : index
    %c0_81 = arith.constant 0 : index
    %c0_82 = arith.constant 0 : index
    %161 = vector.load %arg12[%c1_80, %c0_81, %c0_82] : memref<9x16x16xbf16, #tpu.memory_space<vmem>>, vector<1x16x16xbf16>
    %162 = vector.shape_cast %161 : vector<1x16x16xbf16> to vector<16x16xbf16>
    %cst_83 = arith.constant dense<0.000000e+00> : vector<16x256xf32>
    %163 = tpu.matmul %162, %160, %cst_83 {dimension_numbers = #tpu.dot_dimension_numbers<[1], [0], [0], [1], [0, 0, 1, 1], [], []>} : vector<16x16xbf16>, vector<16x256xbf16>, vector<16x256xf32> -> vector<16x256xf32>
    %164 = arith.addf %157, %163 : vector<16x256xf32>
    %cst_84 = arith.constant 0.000000e+00 : bf16
    %165 = vector.broadcast %cst_84 : bf16 to vector<16x15xbf16>
    %166 = vector.extract_strided_slice %145 {offsets = [0, 0], sizes = [16, 241], strides = [1, 1]} : vector<16x256xbf16> to vector<16x241xbf16>
    %167 = tpu.concatenate %165, %166 in 1 : vector<16x15xbf16>, vector<16x241xbf16> -> vector<16x256xbf16>
    %cst_85 = arith.constant 0.000000e+00 : bf16
    %168 = vector.broadcast %cst_85 : bf16 to vector<16x256xbf16>
    %169 = vector.shape_cast %20 : vector<1x256xi1> to vector<1x256xi1>
    %170 = vector.broadcast %169 : vector<1x256xi1> to vector<16x256xi1>
    %171 = arith.select %170, %167, %168 : vector<16x256xi1>, vector<16x256xbf16>
    %c2_86 = arith.constant 2 : index
    %c0_87 = arith.constant 0 : index
    %c0_88 = arith.constant 0 : index
    %172 = vector.load %arg12[%c2_86, %c0_87, %c0_88] : memref<9x16x16xbf16, #tpu.memory_space<vmem>>, vector<1x16x16xbf16>
    %173 = vector.shape_cast %172 : vector<1x16x16xbf16> to vector<16x16xbf16>
    %cst_89 = arith.constant dense<0.000000e+00> : vector<16x256xf32>
    %174 = tpu.matmul %173, %171, %cst_89 {dimension_numbers = #tpu.dot_dimension_numbers<[1], [0], [0], [1], [0, 0, 1, 1], [], []>} : vector<16x16xbf16>, vector<16x256xbf16>, vector<16x256xf32> -> vector<16x256xf32>
    %175 = arith.addf %164, %174 : vector<16x256xf32>
    %cst_90 = arith.constant 0.000000e+00 : bf16
    %176 = vector.broadcast %cst_90 : bf16 to vector<16x1xbf16>
    %177 = vector.extract_strided_slice %145 {offsets = [0, 0], sizes = [16, 255], strides = [1, 1]} : vector<16x256xbf16> to vector<16x255xbf16>
    %178 = tpu.concatenate %176, %177 in 1 : vector<16x1xbf16>, vector<16x255xbf16> -> vector<16x256xbf16>
    %cst_91 = arith.constant 0.000000e+00 : bf16
    %179 = vector.broadcast %cst_91 : bf16 to vector<16x256xbf16>
    %180 = vector.shape_cast %18 : vector<1x256xi1> to vector<1x256xi1>
    %181 = vector.broadcast %180 : vector<1x256xi1> to vector<16x256xi1>
    %182 = arith.select %181, %178, %179 : vector<16x256xi1>, vector<16x256xbf16>
    %c3_92 = arith.constant 3 : index
    %c0_93 = arith.constant 0 : index
    %c0_94 = arith.constant 0 : index
    %183 = vector.load %arg12[%c3_92, %c0_93, %c0_94] : memref<9x16x16xbf16, #tpu.memory_space<vmem>>, vector<1x16x16xbf16>
    %184 = vector.shape_cast %183 : vector<1x16x16xbf16> to vector<16x16xbf16>
    %cst_95 = arith.constant dense<0.000000e+00> : vector<16x256xf32>
    %185 = tpu.matmul %184, %182, %cst_95 {dimension_numbers = #tpu.dot_dimension_numbers<[1], [0], [0], [1], [0, 0, 1, 1], [], []>} : vector<16x16xbf16>, vector<16x256xbf16>, vector<16x256xf32> -> vector<16x256xf32>
    %186 = arith.addf %175, %185 : vector<16x256xf32>
    %c4_96 = arith.constant 4 : index
    %c0_97 = arith.constant 0 : index
    %c0_98 = arith.constant 0 : index
    %187 = vector.load %arg12[%c4_96, %c0_97, %c0_98] : memref<9x16x16xbf16, #tpu.memory_space<vmem>>, vector<1x16x16xbf16>
    %188 = vector.shape_cast %187 : vector<1x16x16xbf16> to vector<16x16xbf16>
    %cst_99 = arith.constant dense<0.000000e+00> : vector<16x256xf32>
    %189 = tpu.matmul %188, %145, %cst_99 {dimension_numbers = #tpu.dot_dimension_numbers<[1], [0], [0], [1], [0, 0, 1, 1], [], []>} : vector<16x16xbf16>, vector<16x256xbf16>, vector<16x256xf32> -> vector<16x256xf32>
    %190 = arith.addf %186, %189 : vector<16x256xf32>
    %cst_100 = arith.constant 0.000000e+00 : bf16
    %191 = vector.broadcast %cst_100 : bf16 to vector<16x1xbf16>
    %192 = vector.extract_strided_slice %145 {offsets = [0, 1], sizes = [16, 255], strides = [1, 1]} : vector<16x256xbf16> to vector<16x255xbf16>
    %193 = tpu.concatenate %192, %191 in 1 : vector<16x255xbf16>, vector<16x1xbf16> -> vector<16x256xbf16>
    %cst_101 = arith.constant 0.000000e+00 : bf16
    %194 = vector.broadcast %cst_101 : bf16 to vector<16x256xbf16>
    %195 = vector.shape_cast %20 : vector<1x256xi1> to vector<1x256xi1>
    %196 = vector.broadcast %195 : vector<1x256xi1> to vector<16x256xi1>
    %197 = arith.select %196, %193, %194 : vector<16x256xi1>, vector<16x256xbf16>
    %c5_102 = arith.constant 5 : index
    %c0_103 = arith.constant 0 : index
    %c0_104 = arith.constant 0 : index
    %198 = vector.load %arg12[%c5_102, %c0_103, %c0_104] : memref<9x16x16xbf16, #tpu.memory_space<vmem>>, vector<1x16x16xbf16>
    %199 = vector.shape_cast %198 : vector<1x16x16xbf16> to vector<16x16xbf16>
    %cst_105 = arith.constant dense<0.000000e+00> : vector<16x256xf32>
    %200 = tpu.matmul %199, %197, %cst_105 {dimension_numbers = #tpu.dot_dimension_numbers<[1], [0], [0], [1], [0, 0, 1, 1], [], []>} : vector<16x16xbf16>, vector<16x256xbf16>, vector<16x256xf32> -> vector<16x256xf32>
    %201 = arith.addf %190, %200 : vector<16x256xf32>
    %cst_106 = arith.constant 0.000000e+00 : bf16
    %202 = vector.broadcast %cst_106 : bf16 to vector<16x15xbf16>
    %203 = vector.extract_strided_slice %145 {offsets = [0, 15], sizes = [16, 241], strides = [1, 1]} : vector<16x256xbf16> to vector<16x241xbf16>
    %204 = tpu.concatenate %203, %202 in 1 : vector<16x241xbf16>, vector<16x15xbf16> -> vector<16x256xbf16>
    %cst_107 = arith.constant 0.000000e+00 : bf16
    %205 = vector.broadcast %cst_107 : bf16 to vector<16x256xbf16>
    %206 = vector.shape_cast %18 : vector<1x256xi1> to vector<1x256xi1>
    %207 = vector.broadcast %206 : vector<1x256xi1> to vector<16x256xi1>
    %208 = arith.select %207, %204, %205 : vector<16x256xi1>, vector<16x256xbf16>
    %c6_108 = arith.constant 6 : index
    %c0_109 = arith.constant 0 : index
    %c0_110 = arith.constant 0 : index
    %209 = vector.load %arg12[%c6_108, %c0_109, %c0_110] : memref<9x16x16xbf16, #tpu.memory_space<vmem>>, vector<1x16x16xbf16>
    %210 = vector.shape_cast %209 : vector<1x16x16xbf16> to vector<16x16xbf16>
    %cst_111 = arith.constant dense<0.000000e+00> : vector<16x256xf32>
    %211 = tpu.matmul %210, %208, %cst_111 {dimension_numbers = #tpu.dot_dimension_numbers<[1], [0], [0], [1], [0, 0, 1, 1], [], []>} : vector<16x16xbf16>, vector<16x256xbf16>, vector<16x256xf32> -> vector<16x256xf32>
    %212 = arith.addf %201, %211 : vector<16x256xf32>
    %cst_112 = arith.constant 0.000000e+00 : bf16
    %213 = vector.broadcast %cst_112 : bf16 to vector<16x16xbf16>
    %214 = vector.extract_strided_slice %145 {offsets = [0, 16], sizes = [16, 240], strides = [1, 1]} : vector<16x256xbf16> to vector<16x240xbf16>
    %215 = tpu.concatenate %214, %213 in 1 : vector<16x240xbf16>, vector<16x16xbf16> -> vector<16x256xbf16>
    %c7_113 = arith.constant 7 : index
    %c0_114 = arith.constant 0 : index
    %c0_115 = arith.constant 0 : index
    %216 = vector.load %arg12[%c7_113, %c0_114, %c0_115] : memref<9x16x16xbf16, #tpu.memory_space<vmem>>, vector<1x16x16xbf16>
    %217 = vector.shape_cast %216 : vector<1x16x16xbf16> to vector<16x16xbf16>
    %cst_116 = arith.constant dense<0.000000e+00> : vector<16x256xf32>
    %218 = tpu.matmul %217, %215, %cst_116 {dimension_numbers = #tpu.dot_dimension_numbers<[1], [0], [0], [1], [0, 0, 1, 1], [], []>} : vector<16x16xbf16>, vector<16x256xbf16>, vector<16x256xf32> -> vector<16x256xf32>
    %219 = arith.addf %212, %218 : vector<16x256xf32>
    %cst_117 = arith.constant 0.000000e+00 : bf16
    %220 = vector.broadcast %cst_117 : bf16 to vector<16x17xbf16>
    %221 = vector.extract_strided_slice %145 {offsets = [0, 17], sizes = [16, 239], strides = [1, 1]} : vector<16x256xbf16> to vector<16x239xbf16>
    %222 = tpu.concatenate %221, %220 in 1 : vector<16x239xbf16>, vector<16x17xbf16> -> vector<16x256xbf16>
    %cst_118 = arith.constant 0.000000e+00 : bf16
    %223 = vector.broadcast %cst_118 : bf16 to vector<16x256xbf16>
    %224 = vector.shape_cast %20 : vector<1x256xi1> to vector<1x256xi1>
    %225 = vector.broadcast %224 : vector<1x256xi1> to vector<16x256xi1>
    %226 = arith.select %225, %222, %223 : vector<16x256xi1>, vector<16x256xbf16>
    %c8_119 = arith.constant 8 : index
    %c0_120 = arith.constant 0 : index
    %c0_121 = arith.constant 0 : index
    %227 = vector.load %arg12[%c8_119, %c0_120, %c0_121] : memref<9x16x16xbf16, #tpu.memory_space<vmem>>, vector<1x16x16xbf16>
    %228 = vector.shape_cast %227 : vector<1x16x16xbf16> to vector<16x16xbf16>
    %cst_122 = arith.constant dense<0.000000e+00> : vector<16x256xf32>
    %229 = tpu.matmul %228, %226, %cst_122 {dimension_numbers = #tpu.dot_dimension_numbers<[1], [0], [0], [1], [0, 0, 1, 1], [], []>} : vector<16x16xbf16>, vector<16x256xbf16>, vector<16x256xf32> -> vector<16x256xf32>
    %230 = arith.addf %219, %229 : vector<16x256xf32>
    %c0_123 = arith.constant 0 : index
    %c0_124 = arith.constant 0 : index
    %231 = vector.load %arg13[%c0_123, %c0_124] : memref<16x1xf32, #tpu.memory_space<vmem>>, vector<16x1xf32>
    %232 = vector.broadcast %231 : vector<16x1xf32> to vector<16x256xf32>
    %233 = arith.addf %230, %232 : vector<16x256xf32>
    %234 = tpu.concatenate %233, %128 in 0 : vector<16x256xf32>, vector<32x256xf32> -> vector<48x256xf32>
    %c0_125 = arith.constant 0 : index
    %c0_126 = arith.constant 0 : index
    %235 = vector.load %arg14[%c0_125, %c0_126] : memref<48x1xf32, #tpu.memory_space<vmem>>, vector<48x1xf32>
    %236 = vector.broadcast %235 : vector<48x1xf32> to vector<48x256xf32>
    %237 = arith.mulf %234, %236 : vector<48x256xf32>
    %c0_127 = arith.constant 0 : index
    %c0_128 = arith.constant 0 : index
    %238 = vector.load %arg15[%c0_127, %c0_128] : memref<48x1xf32, #tpu.memory_space<vmem>>, vector<48x1xf32>
    %239 = vector.broadcast %238 : vector<48x1xf32> to vector<48x256xf32>
    %240 = arith.addf %237, %239 : vector<48x256xf32>
    %cst_129 = arith.constant 0.000000e+00 : f32
    %241 = vector.broadcast %cst_129 : f32 to vector<48x256xf32>
    %242 = arith.maximumf %240, %241 : vector<48x256xf32>
    %243 = arith.truncf %242 : vector<48x256xf32> to vector<48x256xbf16>
    %c0_130 = arith.constant 0 : index
    %c0_131 = arith.constant 0 : index
    %244 = vector.load %arg16[%c0_130, %c0_131] : memref<16x48xbf16, #tpu.memory_space<vmem>>, vector<16x48xbf16>
    %cst_132 = arith.constant dense<0.000000e+00> : vector<16x256xf32>
    %245 = tpu.matmul %244, %243, %cst_132 {dimension_numbers = #tpu.dot_dimension_numbers<[1], [0], [0], [1], [0, 0, 1, 1], [], []>} : vector<16x48xbf16>, vector<48x256xbf16>, vector<16x256xf32> -> vector<16x256xf32>
    %c0_133 = arith.constant 0 : index
    %c0_134 = arith.constant 0 : index
    %246 = vector.load %arg17[%c0_133, %c0_134] : memref<16x1xf32, #tpu.memory_space<vmem>>, vector<16x1xf32>
    %247 = vector.broadcast %246 : vector<16x1xf32> to vector<16x256xf32>
    %248 = arith.addf %245, %247 : vector<16x256xf32>
    %cst_135 = arith.constant 0.000000e+00 : f32
    %249 = vector.broadcast %cst_135 : f32 to vector<16x256xf32>
    %250 = arith.maximumf %248, %249 : vector<16x256xf32>
    %251 = arith.truncf %250 : vector<16x256xf32> to vector<16x256xbf16>
    %cst_136 = arith.constant 0.000000e+00 : f32
    %252 = vector.broadcast %cst_136 : f32 to vector<16x256xf32>
    %cst_137 = arith.constant 0.000000e+00 : bf16
    %253 = vector.broadcast %cst_137 : bf16 to vector<16x17xbf16>
    %254 = vector.extract_strided_slice %251 {offsets = [0, 0], sizes = [16, 239], strides = [1, 1]} : vector<16x256xbf16> to vector<16x239xbf16>
    %255 = tpu.concatenate %253, %254 in 1 : vector<16x17xbf16>, vector<16x239xbf16> -> vector<16x256xbf16>
    %cst_138 = arith.constant 0.000000e+00 : bf16
    %256 = vector.broadcast %cst_138 : bf16 to vector<16x256xbf16>
    %257 = vector.shape_cast %18 : vector<1x256xi1> to vector<1x256xi1>
    %258 = vector.broadcast %257 : vector<1x256xi1> to vector<16x256xi1>
    %259 = arith.select %258, %255, %256 : vector<16x256xi1>, vector<16x256xbf16>
    %c0_139 = arith.constant 0 : index
    %c0_140 = arith.constant 0 : index
    %c0_141 = arith.constant 0 : index
    %260 = vector.load %arg18[%c0_139, %c0_140, %c0_141] : memref<9x16x16xbf16, #tpu.memory_space<vmem>>, vector<1x16x16xbf16>
    %261 = vector.shape_cast %260 : vector<1x16x16xbf16> to vector<16x16xbf16>
    %cst_142 = arith.constant dense<0.000000e+00> : vector<16x256xf32>
    %262 = tpu.matmul %261, %259, %cst_142 {dimension_numbers = #tpu.dot_dimension_numbers<[1], [0], [0], [1], [0, 0, 1, 1], [], []>} : vector<16x16xbf16>, vector<16x256xbf16>, vector<16x256xf32> -> vector<16x256xf32>
    %263 = arith.addf %252, %262 : vector<16x256xf32>
    %cst_143 = arith.constant 0.000000e+00 : bf16
    %264 = vector.broadcast %cst_143 : bf16 to vector<16x16xbf16>
    %265 = vector.extract_strided_slice %251 {offsets = [0, 0], sizes = [16, 240], strides = [1, 1]} : vector<16x256xbf16> to vector<16x240xbf16>
    %266 = tpu.concatenate %264, %265 in 1 : vector<16x16xbf16>, vector<16x240xbf16> -> vector<16x256xbf16>
    %c1_144 = arith.constant 1 : index
    %c0_145 = arith.constant 0 : index
    %c0_146 = arith.constant 0 : index
    %267 = vector.load %arg18[%c1_144, %c0_145, %c0_146] : memref<9x16x16xbf16, #tpu.memory_space<vmem>>, vector<1x16x16xbf16>
    %268 = vector.shape_cast %267 : vector<1x16x16xbf16> to vector<16x16xbf16>
    %cst_147 = arith.constant dense<0.000000e+00> : vector<16x256xf32>
    %269 = tpu.matmul %268, %266, %cst_147 {dimension_numbers = #tpu.dot_dimension_numbers<[1], [0], [0], [1], [0, 0, 1, 1], [], []>} : vector<16x16xbf16>, vector<16x256xbf16>, vector<16x256xf32> -> vector<16x256xf32>
    %270 = arith.addf %263, %269 : vector<16x256xf32>
    %cst_148 = arith.constant 0.000000e+00 : bf16
    %271 = vector.broadcast %cst_148 : bf16 to vector<16x15xbf16>
    %272 = vector.extract_strided_slice %251 {offsets = [0, 0], sizes = [16, 241], strides = [1, 1]} : vector<16x256xbf16> to vector<16x241xbf16>
    %273 = tpu.concatenate %271, %272 in 1 : vector<16x15xbf16>, vector<16x241xbf16> -> vector<16x256xbf16>
    %cst_149 = arith.constant 0.000000e+00 : bf16
    %274 = vector.broadcast %cst_149 : bf16 to vector<16x256xbf16>
    %275 = vector.shape_cast %20 : vector<1x256xi1> to vector<1x256xi1>
    %276 = vector.broadcast %275 : vector<1x256xi1> to vector<16x256xi1>
    %277 = arith.select %276, %273, %274 : vector<16x256xi1>, vector<16x256xbf16>
    %c2_150 = arith.constant 2 : index
    %c0_151 = arith.constant 0 : index
    %c0_152 = arith.constant 0 : index
    %278 = vector.load %arg18[%c2_150, %c0_151, %c0_152] : memref<9x16x16xbf16, #tpu.memory_space<vmem>>, vector<1x16x16xbf16>
    %279 = vector.shape_cast %278 : vector<1x16x16xbf16> to vector<16x16xbf16>
    %cst_153 = arith.constant dense<0.000000e+00> : vector<16x256xf32>
    %280 = tpu.matmul %279, %277, %cst_153 {dimension_numbers = #tpu.dot_dimension_numbers<[1], [0], [0], [1], [0, 0, 1, 1], [], []>} : vector<16x16xbf16>, vector<16x256xbf16>, vector<16x256xf32> -> vector<16x256xf32>
    %281 = arith.addf %270, %280 : vector<16x256xf32>
    %cst_154 = arith.constant 0.000000e+00 : bf16
    %282 = vector.broadcast %cst_154 : bf16 to vector<16x1xbf16>
    %283 = vector.extract_strided_slice %251 {offsets = [0, 0], sizes = [16, 255], strides = [1, 1]} : vector<16x256xbf16> to vector<16x255xbf16>
    %284 = tpu.concatenate %282, %283 in 1 : vector<16x1xbf16>, vector<16x255xbf16> -> vector<16x256xbf16>
    %cst_155 = arith.constant 0.000000e+00 : bf16
    %285 = vector.broadcast %cst_155 : bf16 to vector<16x256xbf16>
    %286 = vector.shape_cast %18 : vector<1x256xi1> to vector<1x256xi1>
    %287 = vector.broadcast %286 : vector<1x256xi1> to vector<16x256xi1>
    %288 = arith.select %287, %284, %285 : vector<16x256xi1>, vector<16x256xbf16>
    %c3_156 = arith.constant 3 : index
    %c0_157 = arith.constant 0 : index
    %c0_158 = arith.constant 0 : index
    %289 = vector.load %arg18[%c3_156, %c0_157, %c0_158] : memref<9x16x16xbf16, #tpu.memory_space<vmem>>, vector<1x16x16xbf16>
    %290 = vector.shape_cast %289 : vector<1x16x16xbf16> to vector<16x16xbf16>
    %cst_159 = arith.constant dense<0.000000e+00> : vector<16x256xf32>
    %291 = tpu.matmul %290, %288, %cst_159 {dimension_numbers = #tpu.dot_dimension_numbers<[1], [0], [0], [1], [0, 0, 1, 1], [], []>} : vector<16x16xbf16>, vector<16x256xbf16>, vector<16x256xf32> -> vector<16x256xf32>
    %292 = arith.addf %281, %291 : vector<16x256xf32>
    %c4_160 = arith.constant 4 : index
    %c0_161 = arith.constant 0 : index
    %c0_162 = arith.constant 0 : index
    %293 = vector.load %arg18[%c4_160, %c0_161, %c0_162] : memref<9x16x16xbf16, #tpu.memory_space<vmem>>, vector<1x16x16xbf16>
    %294 = vector.shape_cast %293 : vector<1x16x16xbf16> to vector<16x16xbf16>
    %cst_163 = arith.constant dense<0.000000e+00> : vector<16x256xf32>
    %295 = tpu.matmul %294, %251, %cst_163 {dimension_numbers = #tpu.dot_dimension_numbers<[1], [0], [0], [1], [0, 0, 1, 1], [], []>} : vector<16x16xbf16>, vector<16x256xbf16>, vector<16x256xf32> -> vector<16x256xf32>
    %296 = arith.addf %292, %295 : vector<16x256xf32>
    %cst_164 = arith.constant 0.000000e+00 : bf16
    %297 = vector.broadcast %cst_164 : bf16 to vector<16x1xbf16>
    %298 = vector.extract_strided_slice %251 {offsets = [0, 1], sizes = [16, 255], strides = [1, 1]} : vector<16x256xbf16> to vector<16x255xbf16>
    %299 = tpu.concatenate %298, %297 in 1 : vector<16x255xbf16>, vector<16x1xbf16> -> vector<16x256xbf16>
    %cst_165 = arith.constant 0.000000e+00 : bf16
    %300 = vector.broadcast %cst_165 : bf16 to vector<16x256xbf16>
    %301 = vector.shape_cast %20 : vector<1x256xi1> to vector<1x256xi1>
    %302 = vector.broadcast %301 : vector<1x256xi1> to vector<16x256xi1>
    %303 = arith.select %302, %299, %300 : vector<16x256xi1>, vector<16x256xbf16>
    %c5_166 = arith.constant 5 : index
    %c0_167 = arith.constant 0 : index
    %c0_168 = arith.constant 0 : index
    %304 = vector.load %arg18[%c5_166, %c0_167, %c0_168] : memref<9x16x16xbf16, #tpu.memory_space<vmem>>, vector<1x16x16xbf16>
    %305 = vector.shape_cast %304 : vector<1x16x16xbf16> to vector<16x16xbf16>
    %cst_169 = arith.constant dense<0.000000e+00> : vector<16x256xf32>
    %306 = tpu.matmul %305, %303, %cst_169 {dimension_numbers = #tpu.dot_dimension_numbers<[1], [0], [0], [1], [0, 0, 1, 1], [], []>} : vector<16x16xbf16>, vector<16x256xbf16>, vector<16x256xf32> -> vector<16x256xf32>
    %307 = arith.addf %296, %306 : vector<16x256xf32>
    %cst_170 = arith.constant 0.000000e+00 : bf16
    %308 = vector.broadcast %cst_170 : bf16 to vector<16x15xbf16>
    %309 = vector.extract_strided_slice %251 {offsets = [0, 15], sizes = [16, 241], strides = [1, 1]} : vector<16x256xbf16> to vector<16x241xbf16>
    %310 = tpu.concatenate %309, %308 in 1 : vector<16x241xbf16>, vector<16x15xbf16> -> vector<16x256xbf16>
    %cst_171 = arith.constant 0.000000e+00 : bf16
    %311 = vector.broadcast %cst_171 : bf16 to vector<16x256xbf16>
    %312 = vector.shape_cast %18 : vector<1x256xi1> to vector<1x256xi1>
    %313 = vector.broadcast %312 : vector<1x256xi1> to vector<16x256xi1>
    %314 = arith.select %313, %310, %311 : vector<16x256xi1>, vector<16x256xbf16>
    %c6_172 = arith.constant 6 : index
    %c0_173 = arith.constant 0 : index
    %c0_174 = arith.constant 0 : index
    %315 = vector.load %arg18[%c6_172, %c0_173, %c0_174] : memref<9x16x16xbf16, #tpu.memory_space<vmem>>, vector<1x16x16xbf16>
    %316 = vector.shape_cast %315 : vector<1x16x16xbf16> to vector<16x16xbf16>
    %cst_175 = arith.constant dense<0.000000e+00> : vector<16x256xf32>
    %317 = tpu.matmul %316, %314, %cst_175 {dimension_numbers = #tpu.dot_dimension_numbers<[1], [0], [0], [1], [0, 0, 1, 1], [], []>} : vector<16x16xbf16>, vector<16x256xbf16>, vector<16x256xf32> -> vector<16x256xf32>
    %318 = arith.addf %307, %317 : vector<16x256xf32>
    %cst_176 = arith.constant 0.000000e+00 : bf16
    %319 = vector.broadcast %cst_176 : bf16 to vector<16x16xbf16>
    %320 = vector.extract_strided_slice %251 {offsets = [0, 16], sizes = [16, 240], strides = [1, 1]} : vector<16x256xbf16> to vector<16x240xbf16>
    %321 = tpu.concatenate %320, %319 in 1 : vector<16x240xbf16>, vector<16x16xbf16> -> vector<16x256xbf16>
    %c7_177 = arith.constant 7 : index
    %c0_178 = arith.constant 0 : index
    %c0_179 = arith.constant 0 : index
    %322 = vector.load %arg18[%c7_177, %c0_178, %c0_179] : memref<9x16x16xbf16, #tpu.memory_space<vmem>>, vector<1x16x16xbf16>
    %323 = vector.shape_cast %322 : vector<1x16x16xbf16> to vector<16x16xbf16>
    %cst_180 = arith.constant dense<0.000000e+00> : vector<16x256xf32>
    %324 = tpu.matmul %323, %321, %cst_180 {dimension_numbers = #tpu.dot_dimension_numbers<[1], [0], [0], [1], [0, 0, 1, 1], [], []>} : vector<16x16xbf16>, vector<16x256xbf16>, vector<16x256xf32> -> vector<16x256xf32>
    %325 = arith.addf %318, %324 : vector<16x256xf32>
    %cst_181 = arith.constant 0.000000e+00 : bf16
    %326 = vector.broadcast %cst_181 : bf16 to vector<16x17xbf16>
    %327 = vector.extract_strided_slice %251 {offsets = [0, 17], sizes = [16, 239], strides = [1, 1]} : vector<16x256xbf16> to vector<16x239xbf16>
    %328 = tpu.concatenate %327, %326 in 1 : vector<16x239xbf16>, vector<16x17xbf16> -> vector<16x256xbf16>
    %cst_182 = arith.constant 0.000000e+00 : bf16
    %329 = vector.broadcast %cst_182 : bf16 to vector<16x256xbf16>
    %330 = vector.shape_cast %20 : vector<1x256xi1> to vector<1x256xi1>
    %331 = vector.broadcast %330 : vector<1x256xi1> to vector<16x256xi1>
    %332 = arith.select %331, %328, %329 : vector<16x256xi1>, vector<16x256xbf16>
    %c8_183 = arith.constant 8 : index
    %c0_184 = arith.constant 0 : index
    %c0_185 = arith.constant 0 : index
    %333 = vector.load %arg18[%c8_183, %c0_184, %c0_185] : memref<9x16x16xbf16, #tpu.memory_space<vmem>>, vector<1x16x16xbf16>
    %334 = vector.shape_cast %333 : vector<1x16x16xbf16> to vector<16x16xbf16>
    %cst_186 = arith.constant dense<0.000000e+00> : vector<16x256xf32>
    %335 = tpu.matmul %334, %332, %cst_186 {dimension_numbers = #tpu.dot_dimension_numbers<[1], [0], [0], [1], [0, 0, 1, 1], [], []>} : vector<16x16xbf16>, vector<16x256xbf16>, vector<16x256xf32> -> vector<16x256xf32>
    %336 = arith.addf %325, %335 : vector<16x256xf32>
    %c0_187 = arith.constant 0 : index
    %c0_188 = arith.constant 0 : index
    %337 = vector.load %arg19[%c0_187, %c0_188] : memref<16x1xf32, #tpu.memory_space<vmem>>, vector<16x1xf32>
    %338 = vector.broadcast %337 : vector<16x1xf32> to vector<16x256xf32>
    %339 = arith.addf %336, %338 : vector<16x256xf32>
    %340 = vector.shape_cast %339 : vector<16x256xf32> to vector<1x16x256xf32>
    %c0_189 = arith.constant 0 : index
    %c0_190 = arith.constant 0 : index
    %c0_191 = arith.constant 0 : index
    %341 = vector.load %arg20[%c0_189, %c0_190, %c0_191] : memref<1x16x256xf32, #tpu.memory_space<vmem>>, vector<1x16x256xf32>
    tpu.vector_store %arg20[%c0_189, %c0_190, %c0_191], %340 {strides = array<i32>} : memref<1x16x256xf32, #tpu.memory_space<vmem>>, vector<1x16x256xf32>,
    return
  }
  func.func @transform_0(%arg0: i32) -> (i32, i32, i32) {
    %c0_i32 = arith.constant 0 : i32
    %c0_i32_0 = arith.constant 0 : i32
    %c0_i32_1 = arith.constant 0 : i32
    return %arg0, %c0_i32, %c0_i32_0 : i32, i32, i32
  }
  func.func @transform_1(%arg0: i32) -> (i32, i32) {
    %c0_i32 = arith.constant 0 : i32
    %c0_i32_0 = arith.constant 0 : i32
    %c0_i32_1 = arith.constant 0 : i32
    return %c0_i32, %c0_i32_0 : i32, i32
  }
  func.func @transform_2(%arg0: i32) -> (i32, i32) {
    %c0_i32 = arith.constant 0 : i32
    %c0_i32_0 = arith.constant 0 : i32
    %c0_i32_1 = arith.constant 0 : i32
    return %c0_i32, %c0_i32_0 : i32, i32
  }
  func.func @transform_3(%arg0: i32) -> (i32, i32) {
    %c0_i32 = arith.constant 0 : i32
    %c0_i32_0 = arith.constant 0 : i32
    %c0_i32_1 = arith.constant 0 : i32
    return %c0_i32, %c0_i32_0 : i32, i32
  }
  func.func @transform_4(%arg0: i32) -> (i32, i32) {
    %c0_i32 = arith.constant 0 : i32
    %c0_i32_0 = arith.constant 0 : i32
    %c0_i32_1 = arith.constant 0 : i32
    return %c0_i32, %c0_i32_0 : i32, i32
  }
  func.func @transform_5(%arg0: i32) -> (i32, i32, i32) {
    %c0_i32 = arith.constant 0 : i32
    %c0_i32_0 = arith.constant 0 : i32
    %c0_i32_1 = arith.constant 0 : i32
    %c0_i32_2 = arith.constant 0 : i32
    return %c0_i32, %c0_i32_0, %c0_i32_1 : i32, i32, i32
  }
  func.func @transform_6(%arg0: i32) -> (i32, i32) {
    %c0_i32 = arith.constant 0 : i32
    %c0_i32_0 = arith.constant 0 : i32
    %c0_i32_1 = arith.constant 0 : i32
    return %c0_i32, %c0_i32_0 : i32, i32
  }
  func.func @transform_7(%arg0: i32) -> (i32, i32) {
    %c0_i32 = arith.constant 0 : i32
    %c0_i32_0 = arith.constant 0 : i32
    %c0_i32_1 = arith.constant 0 : i32
    return %c0_i32, %c0_i32_0 : i32, i32
  }
  func.func @transform_8(%arg0: i32) -> (i32, i32) {
    %c0_i32 = arith.constant 0 : i32
    %c0_i32_0 = arith.constant 0 : i32
    %c0_i32_1 = arith.constant 0 : i32
    return %c0_i32, %c0_i32_0 : i32, i32
  }
  func.func @transform_9(%arg0: i32) -> (i32, i32) {
    %c0_i32 = arith.constant 0 : i32
    %c0_i32_0 = arith.constant 0 : i32
    %c0_i32_1 = arith.constant 0 : i32
    return %c0_i32, %c0_i32_0 : i32, i32
  }
  func.func @transform_10(%arg0: i32) -> (i32, i32) {
    %c0_i32 = arith.constant 0 : i32
    %c0_i32_0 = arith.constant 0 : i32
    %c0_i32_1 = arith.constant 0 : i32
    return %c0_i32, %c0_i32_0 : i32, i32
  }
  func.func @transform_11(%arg0: i32) -> (i32, i32, i32) {
    %c0_i32 = arith.constant 0 : i32
    %c0_i32_0 = arith.constant 0 : i32
    %c0_i32_1 = arith.constant 0 : i32
    %c0_i32_2 = arith.constant 0 : i32
    return %c0_i32, %c0_i32_0, %c0_i32_1 : i32, i32, i32
  }
  func.func @transform_12(%arg0: i32) -> (i32, i32) {
    %c0_i32 = arith.constant 0 : i32
    %c0_i32_0 = arith.constant 0 : i32
    %c0_i32_1 = arith.constant 0 : i32
    return %c0_i32, %c0_i32_0 : i32, i32
  }
  func.func @transform_13(%arg0: i32) -> (i32, i32) {
    %c0_i32 = arith.constant 0 : i32
    %c0_i32_0 = arith.constant 0 : i32
    %c0_i32_1 = arith.constant 0 : i32
    return %c0_i32, %c0_i32_0 : i32, i32
  }
  func.func @transform_14(%arg0: i32) -> (i32, i32) {
    %c0_i32 = arith.constant 0 : i32
    %c0_i32_0 = arith.constant 0 : i32
    %c0_i32_1 = arith.constant 0 : i32
    return %c0_i32, %c0_i32_0 : i32, i32
  }
  func.func @transform_15(%arg0: i32) -> (i32, i32) {
    %c0_i32 = arith.constant 0 : i32
    %c0_i32_0 = arith.constant 0 : i32
    %c0_i32_1 = arith.constant 0 : i32
    return %c0_i32, %c0_i32_0 : i32, i32
  }
  func.func @transform_16(%arg0: i32) -> (i32, i32) {
    %c0_i32 = arith.constant 0 : i32
    %c0_i32_0 = arith.constant 0 : i32
    %c0_i32_1 = arith.constant 0 : i32
    return %c0_i32, %c0_i32_0 : i32, i32
  }
  func.func @transform_17(%arg0: i32) -> (i32, i32, i32) {
    %c0_i32 = arith.constant 0 : i32
    %c0_i32_0 = arith.constant 0 : i32
    %c0_i32_1 = arith.constant 0 : i32
    %c0_i32_2 = arith.constant 0 : i32
    return %c0_i32, %c0_i32_0, %c0_i32_1 : i32, i32, i32
  }
  func.func @transform_18(%arg0: i32) -> (i32, i32) {
    %c0_i32 = arith.constant 0 : i32
    %c0_i32_0 = arith.constant 0 : i32
    %c0_i32_1 = arith.constant 0 : i32
    return %c0_i32, %c0_i32_0 : i32, i32
  }
  func.func @transform_19(%arg0: i32) -> (i32, i32, i32) {
    %c0_i32 = arith.constant 0 : i32
    %c0_i32_0 = arith.constant 0 : i32
    %c0_i32_1 = arith.constant 0 : i32
    return %arg0, %c0_i32, %c0_i32_0 : i32, i32, i32
  }
}

</mosaic_0001>

<bundles_post_ra>
// kernel: dense_block_forward.1
= control target key start
LH: loop header
LB: loop body
LE: loop exit
PB: predicated region body
PF: predicated region fallthrough
CT: control target
= control target key end

     0   :  { %s3919_s0 = inlined_call_operand.vmem [shape: f32[2,16,256], index: 0, kind: input, shape index: {}]   ;;  %s3920_s1 = inlined_call_operand.vmem [shape: f32[16,1], index: 1, kind: input, shape index: {}]   ;;  %s3921_s2 = inlined_call_operand.vmem [shape: f32[16,1], index: 2, kind: input, shape index: {}]   ;;  %s3922_s3 = inlined_call_operand.vmem [shape: bf16[16,16], index: 3, kind: input, shape index: {}]   ;;  %s3923_s4 = inlined_call_operand.vmem [shape: f32[16,1], index: 4, kind: input, shape index: {}]   ;;  %s3924_s5 = inlined_call_operand.vmem [shape: bf16[9,16,16], index: 5, kind: input, shape index: {}]   ;;  %s3925_s6 = inlined_call_operand.vmem [shape: f32[16,1], index: 6, kind: input, shape index: {}]   ;;  %s3926_s7 = inlined_call_operand.vmem [shape: f32[32,1], index: 7, kind: input, shape index: {}]   ;;  %s3927_s8 = inlined_call_operand.vmem [shape: f32[32,1], index: 8, kind: input, shape index: {}]   ;;  %s3928_s9 = inlined_call_operand.vmem [shape: bf16[16,32], index: 9, kind: input, shape index: {}]   ;;  %s3929_s10 = inlined_call_operand.vmem [shape: f32[16,1], index: 10, kind: input, shape index: {}]   ;;  %s3930_s11 = inlined_call_operand.vmem [shape: bf16[9,16,16], index: 11, kind: input, shape index: {}]   ;;  %s3931_s12 = inlined_call_operand.vmem [shape: f32[16,1], index: 12, kind: input, shape index: {}]   ;;  %s3932_s13 = inlined_call_operand.vmem [shape: f32[48,1], index: 13, kind: input, shape index: {}]   ;;  %s3933_s14 = inlined_call_operand.vmem [shape: f32[48,1], index: 14, kind: input, shape index: {}]   ;;  %s3934_s15 = inlined_call_operand.vmem [shape: bf16[16,48], index: 15, kind: input, shape index: {}]   ;;  %s3935_s16 = inlined_call_operand.vmem [shape: f32[16,1], index: 16, kind: input, shape index: {}]   ;;  %s3936_s17 = inlined_call_operand.vmem [shape: bf16[9,16,16], index: 17, kind: input, shape index: {}]   ;;  %s3937_s18 = inlined_call_operand.vmem [shape: f32[16,1], index: 18, kind: input, shape index: {}]   ;;  %s3938_s19 = inlined_call_operand.vmem [shape: f32[2,16,256], index: 19, kind: output, shape index: {}]  }
   0x1   :  { %3959 = sst [smem:[#allocation2_spill]] %s3919_s0  ;;  %s3351_s0 = smov 0  }
   0x2   :  { %3960 = sst [smem:[#allocation3_spill]] %s3920_s1 }
   0x3   :  { %3961 = sst [smem:[#allocation4_spill]] %s3921_s2 }
   0x4   :  { %3962 = sst [smem:[#allocation5_spill]] %s3922_s3 }
   0x5   :  { %3963 = sst [smem:[#allocation6_spill]] %s3923_s4 }
   0x6   :  { %3964 = sst [smem:[#allocation7_spill]] %s3924_s5 }
   0x7   :  { %3965 = sst [smem:[#allocation8_spill]] %s3925_s6 }
   0x8   :  { %3966 = sst [smem:[#allocation9_spill]] %s3926_s7 }
   0x9   :  { %3967 = sst [smem:[#allocation10_spill]] %s3927_s8 }
   0xa LB: > { %s3037_s30 = sadd.s32 4294967295, %s3240_s0   ;;  %p3041_p0 = scmp.ge.s32.totalorder %s3240_s0, 1  ;;  %s3240_s0 = sphi %s3351_s0, %s29_s0  }
   0xb   : > { %p537_p1 = scmp.lt.s32.totalorder %s3240_s0, 3 }
   0xd   : > { %p538_p2 = pnand %p3041_p0, %p537_p1 }
   0xe   : > { %s3968_s1 = sld [smem:[#allocation4_spill]] (!%p538_p2)  ;;  %p593_p3 = scmp.lt.s32.totalorder (!%p538_p2), %s3037_s30, 1 }
   0xf   : > { %541 = sbr.rel (%p538_p2) target bundleno = 1869 (0x74d), region = 96  ;;  %s3969_s23 = sld [smem:[#allocation3_spill]] (!%p538_p2) }
  0x10   : > { %s3970_s4 = sld [smem:[#allocation6_spill]] (!%p538_p2)  ;;  %s3956_s28 = smov (!%p538_p2), 16  }
  0x11   : > { %s3971_s24 = sld [smem:[#allocation2_spill]] (!%p538_p2)  ;;  %s3954_s29 = smov (!%p538_p2), 17  }
  0x12   : > { %s3972_s27 = sld [smem:[#allocation5_spill]] (!%p538_p2)  ;;  %s3950_s20 = smov (!%p538_p2), 15  }
  0x13   : > { %s3946_s22 = smov (!%p538_p2), 1   ;;  %s3944_s2 = smov (!%p538_p2), 127  }
  0x14   : > { %v657_v0 = vld [vmem:[%s3968_s1] sm:$0xff]  ;;  %v3242_v2 = vmov 0   ;;  %v658_v3 = vld [vmem:[%s3968_s1 + $0x8] sm:$0xff]  ;;  %s3989_s30 = smov (!%p593_p3, %s3037_s30), 1  ;;  %vm698_vm0 = vcmask 130048   ;;  %s3952_s3 = smov 111   ;;  %v606_v58 = vlaneseq }
  0x15   : > { %v641_v1 = vld [vmem:[%s3969_s23] sm:$0xff]  ;;  %3203 = vset.pattern.permute.xlu1 %v3242_v2  ;;  %3202 = vset.pattern.permute.xlu0 %v3242_v2  ;;  %v642_v4 = vld [vmem:[%s3969_s23 + $0x8] sm:$0xff]  ;;  %s3941_s21 = sshll.u32 %s3989_s30, 5  ;;  %s3973_s7 = sld [smem:[#allocation9_spill]]  ;;  %vm757_vm7 = vcmask 138240   ;;  %vm3484_vm8 = vmneg %vm698_vm0  ;;  %vm904_vm11 = vcmask 121856  }
  0x16   : > { %661 = vperm.xlu1 %3203, %v657_v0   ;;  %645 = vperm.xlu0 %3202, %v641_v1   ;;  %v682_v5 = vld [vmem:[%s3970_s4 + $0x8] sm:$0xff]  ;;  %v681_v6 = vld [vmem:[%s3970_s4] sm:$0xff]  ;;  %s3974_s6 = sld [smem:[#allocation8_spill]]  ;;  %v607_v59 = vand.u32 127, %v606_v58  ;;  %v772_v63 = vshrl.u32 %v606_v58, 7  ;;  %vm991_vm14 = vcmask 7168  }
  0x17   : > { %734 = vmatprep.mubr.bf16.mxu0 %v3242_v2  ;;  %838 = vmatprep.mubr.bf16.mxu1 %v3242_v2  ;;  %s597_s25 = scalar_lea.vmem %s3971_s24, %s3941_s21  ;;  %s3942_s24 = smov 113   ;;  %v1492_v56 = vld [vmem:[%s3929_s10] sm:$0xff]  ;;  %v1493_v57 = vld [vmem:[%s3929_s10 + $0x8] sm:$0xff]  ;;  %vm1120_vm15 = vcmask 1039360  }
  0x18   : > { %v3389_v7 = vld [vmem:[%s597_s25] sm:$0xff]  ;;  %v3391_v8 = vld [vmem:[%s597_s25 + $0x8] sm:$0xff]  ;;  %v3395_v13 = vld [vmem:[%s597_s25 + $0x10] sm:$0xff]  ;;  %s3975_s8 = sld [smem:[#allocation10_spill]]  ;;  %v608_v60 = vadd.s32 128, %v607_v59  ;;  %v613_v61 = vand.u32 15, %v607_v59 }
  0x19   : > { %v3397_v14 = vld [vmem:[%s597_s25 + $0x18] sm:$0xff]  ;;  %v3204_v29 = vld [vmem:[%s3972_s27] sm:$0xff]   ;;  %s3948_s25 = smov 112   ;;  %v773_v0 = vsub.s32 0, %v772_v63  ;;  %s3978_s5 = sld [smem:[#allocation7_spill]] }
  0x1a   : > { %666 = vperm.xlu1 %3203, %v658_v3   ;;  %650 = vperm.xlu0 %3202, %v642_v4   ;;  %v620_v62 = vand.u32 15, %v608_v60  ;;  %vm633_vm1 = vcmp.ge.s32.totalorder %v613_v61, 1  ;;  %vm635_vm4 = vcmp.le.s32.totalorder %v613_v61, 14  ;;  %v777_v3 = vsub.s32 4, %v772_v63  ;;  %s3983_s26 = smov 113   ;;  %s3984_s27 = smov 112  }
  0x1b   : > { %v1416_v46 = vld [vmem:[%s3973_s7 + $0x10] sm:$0xff]  ;;  %v1417_v47 = vld [vmem:[%s3973_s7 + $0x18] sm:$0xff]  ;;  %v1414_v52 = vld [vmem:[%s3973_s7] sm:$0xff] }
  0x1c   : > { %v1398_v48 = vld [vmem:[%s3974_s6] sm:$0xff]  ;;  %v1399_v49 = vld [vmem:[%s3974_s6 + $0x8] sm:$0xff]  ;;  %vm634_vm2 = vcmp.ge.s32.totalorder %v620_v62, 1  ;;  %vm636_vm5 = vcmp.le.s32.totalorder %v620_v62, 14 }
  0x1d   : > { %v1415_v53 = vld [vmem:[%s3973_s7 + $0x8] sm:$0xff]  ;;  %vm769_vm3 = vmpackc.low %vm634_vm2, %vm633_vm1  ;;  %vm1191_vm1 = vcmask 924672   ;;  %vm1262_vm2 = vcmask 916480  }
  0x1e   : > { %690 = vperm.xlu1 %3203, %v682_v5   ;;  %685 = vperm.xlu0 %3202, %v681_v6   ;;  %v1448_v50 = vld [vmem:[%s3975_s8 + $0x10] sm:$0xff]  ;;  %v1449_v51 = vld [vmem:[%s3975_s8 + $0x18] sm:$0xff]  ;;  %v1446_v54 = vld [vmem:[%s3975_s8] sm:$0xff]  ;;  %v770_v1 = vsel %vm769_vm3, 65537, %v3242_v2  ;;  %vm1331_vm3 = vcmask 908288  }
  0x1f   : > { %v1447_v55 = vld [vmem:[%s3975_s8 + $0x8] sm:$0xff]  ;;  %vm915_vm6 = vmpackc.low %vm636_vm5, %vm635_vm4  ;;  %v3479_v5 = vrot.slane %v770_v1, %v773_v0  ;;  %v3481_v6 = vrot.slane %v770_v1, %v777_v3  ;;  %v3213_v58 = vld [vmem:[%s3978_s5 + $0x40] sm:$0xff]   ;;  %vm1509_vm4 = vcmask 261120   ;;  %vm2310_vm5 = vcmask 392192  }
  0x21   : > { %vm779_vm9 = vcmp.ne.s16.totalorder %v3479_v5, 0  ;;  %vm780_vm10 = vcmp.ne.s16.totalorder %v3481_v6, 0  ;;  %v3230_v5 = vld [vmem:[%s3936_s17 + $0x28] sm:$0xff]   ;;  %v3231_v6 = vld [vmem:[%s3936_s17 + $0x30] sm:$0xff]  }
  0x91   : > { %v662_v9 = vpop.permute.xlu1 %661  ;;  %v646_v10 = vpop.permute.xlu0 %645 }
  0x92   : > { %v653_v11 = vmul.f32 %v646_v10, %v3389_v7  ;;  %v654_v12 = vmul.f32 %v646_v10, %v3391_v8 }
  0x94   : > { %v669_v16 = vadd.f32 %v662_v9, %v653_v11  ;;  %v670_v19 = vadd.f32 %v662_v9, %v654_v12  ;;  %v916_v11 = vsel %vm915_vm6, 65537, %v3242_v2 }
  0x95   : > { %v651_v15 = vpop.permute.xlu0 %650  ;;  %v667_v20 = vpop.permute.xlu1 %666 }
  0x96   : > { %v655_v17 = vmul.f32 %v651_v15, %v3395_v13  ;;  %v656_v18 = vmul.f32 %v651_v15, %v3397_v14  ;;  %v674_v23 = vmax.f32 %v670_v19, 0.0  ;;  %v673_v25 = vmax.f32 %v669_v16, 0.0  ;;  %v3205_v16 = vld [vmem:[%s3978_s5 + $0x8] sm:$0xff]  }
  0x97   : > { %v3500_v19 = vrot.slane %v916_v11, %v777_v3 }
  0x98   : > { %v671_v21 = vadd.f32 %v667_v20, %v655_v17  ;;  %v672_v22 = vadd.f32 %v667_v20, %v656_v18  ;;  %v3498_v18 = vrot.slane %v916_v11, %v773_v0 }
  0x99   : > { %v686_v31 = vpop.permute.xlu0 %685  ;;  %v691_v34 = vpop.permute.xlu1 %690  ;;  %vm926_vm13 = vcmp.ne.s16.totalorder %v3500_v19, 0 }
  0x9a   : > { %v676_v24 = vmax.f32 %v672_v22, 0.0  ;;  %v675_v26 = vmax.f32 %v671_v21, 0.0  ;;  %vm925_vm12 = vcmp.ne.s16.totalorder %v3498_v18, 0  ;;  %v3233_v18 = vld [vmem:[%s3936_s17 + $0x40] sm:$0xff]  }
  0x9c   : > { %v678_v27 = vpack.c.bf16 %v676_v24, %v674_v23  ;;  %v677_v28 = vpack.c.bf16 %v675_v26, %v673_v25  ;;  %v3206_v24 = vld [vmem:[%s3978_s5] sm:$0xff]  }
  0x9e   : > { %716 = vmatprep.subr.bf16.mxu0 %v678_v27 }
  0x9f   : > { %717 = vmatpush1.bf16.msra.mxu0 %v677_v28 }
  0xa2   : > { %3047 = vmatmul.mubr.msk.bf16.vlgmr.msra.gmra.mxu0 %vm698_vm0, %v3204_v29 }
  0xa3   : > { %889 = vmatprep.mubr.bf16.mxu0 %v3242_v2 }
 0x162   : > { %v736_v30 = vpop.f32.mrf.mxu0 }
 0x163   : > { %v737_v33 = vadd.f32 %v736_v30, %v686_v31  ;;  %v3207_v30 = vld [vmem:[%s3978_s5 + $0x10] sm:$0xff]  }
 0x164   : > { %v738_v32 = vpop.f32.mrf.mxu0 }
 0x165   : > { %v739_v36 = vadd.f32 %v738_v32, %v686_v31  ;;  %v745_v39 = vmax.f32 %v737_v33, 0.0 }
 0x166   : > { %v740_v35 = vpop.f32.mrf.mxu0 }
 0x167   : > { %v741_v37 = vadd.f32 %v740_v35, %v691_v34  ;;  %v746_v42 = vmax.f32 %v739_v36, 0.0  ;;  %v3208_v36 = vld [vmem:[%s3978_s5 + $0x18] sm:$0xff]  }
 0x168   : > { %v742_v38 = vpop.f32.mrf.mxu0 }
 0x169   : > { %v747_v40 = vmax.f32 %v741_v37, 0.0  ;;  %v743_v41 = vadd.f32 %v742_v38, %v691_v34 }
 0x16b   : > { %v3406_v43 = vpack.c.bf16 %v747_v40, %v745_v39  ;;  %v748_v44 = vmax.f32 %v743_v41, 0.0 }
 0x16d   : > { %v3408_v45 = vpack.c.bf16 %v748_v44, %v746_v42  ;;  %785 = vrot.lane.b32.xlu0 %v3406_v43, %s3956_s28  ;;  %v3209_v42 = vld [vmem:[%s3978_s5 + $0x20] sm:$0xff]  }
 0x16f   : > { %787 = vrot.lane.b32.xlu1 %v3408_v45, %s3956_s28 }
 0x171   : > { %753 = vrot.lane.b32.xlu0 %v3406_v43, %s3954_s29 }
 0x173   : > { %755 = vrot.lane.b32.xlu1 %v3408_v45, %s3954_s29  ;;  %s3985_s29 = smov 111  }
 0x175   : > { %900 = vrot.lane.b32.xlu0 %v3406_v43, %s3950_s20 }
 0x177   : > { %902 = vrot.lane.b32.xlu1 %v3408_v45, %s3950_s20  ;;  %s3981_s20 = smov 1  }
 0x179   : > { %987 = vrot.lane.b32.xlu0 %v3406_v43, %s3946_s22 }
 0x17b   : > { %989 = vrot.lane.b32.xlu1 %v3408_v45, %s3946_s22  ;;  %s3979_s22 = smov 17  }
 0x17d   : > { %1116 = vrot.lane.b32.xlu0 %v3406_v43, %s3944_s2 }
 0x17f   : > { %1118 = vrot.lane.b32.xlu1 %v3408_v45, %s3944_s2  ;;  %s3980_s2 = smov 15  }
 0x181   : > { %1187 = vrot.lane.b32.xlu0 %v3406_v43, %s3942_s24 }
 0x183   : > { %1189 = vrot.lane.b32.xlu1 %v3408_v45, %s3942_s24 }
 0x185   : > { %1258 = vrot.lane.b32.xlu0 %v3406_v43, %s3948_s25 }
 0x187   : > { %1260 = vrot.lane.b32.xlu1 %v3408_v45, %s3948_s25  ;;  %s3982_s25 = smov 127  }
 0x189   : > { %1327 = vrot.lane.b32.xlu0 %v3406_v43, %s3952_s3 }
 0x18b   : > { %1329 = vrot.lane.b32.xlu1 %v3408_v45, %s3952_s3 }
 0x18d   : > { %1430 = vperm.xlu0 %3202, %v1416_v46  }
 0x18f   : > { %1435 = vperm.xlu1 %3203, %v1417_v47  }
 0x191   : > { %1402 = vperm.xlu0 %3202, %v1398_v48   ;;  %v3210_v48 = vld [vmem:[%s3978_s5 + $0x28] sm:$0xff]  }
 0x193   : > { %1407 = vperm.xlu1 %3203, %v1399_v49  }
 0x195   : > { %1462 = vperm.xlu0 %3202, %v1448_v50  }
 0x197   : > { %1467 = vperm.xlu1 %3203, %v1449_v51   ;;  %v3211_v51 = vld [vmem:[%s3978_s5 + $0x30] sm:$0xff]  }
 0x199   : > { %1420 = vperm.xlu0 %3202, %v1414_v52  }
 0x19b   : > { %1425 = vperm.xlu1 %3203, %v1415_v53  }
 0x19d   : > { %1452 = vperm.xlu0 %3202, %v1446_v54  }
 0x19f   : > { %1457 = vperm.xlu1 %3203, %v1447_v55  }
 0x1a1   : > { %1496 = vperm.xlu0 %3202, %v1492_v56  }
 0x1a3   : > { %1501 = vperm.xlu1 %3203, %v1493_v57   ;;  %v3212_v57 = vld [vmem:[%s3978_s5 + $0x38] sm:$0xff]  }
 0x1df   : > { %v786_v4 = vpop.permute.xlu0 %785 }
 0x1e1   : > { %v788_v9 = vpop.permute.xlu1 %787 }
 0x1e2   : > { %v790_v12 = vsel %vm698_vm0, %v786_v4, %v788_v9 }
 0x1e3   : > { %820 = vmatprep.subr.bf16.mxu1 %v790_v12  ;;  %v754_v15 = vpop.permute.xlu0 %753 }
 0x1e4   : > { %v763_v17 = vsel %vm757_vm7, 0, %v754_v15  ;;  %3052 = vmatpush1.bf16.msk.msra.mxu1 %vm3484_vm8, %v786_v4 }
 0x1e5   : > { %v756_v20 = vpop.permute.xlu1 %755  ;;  %v781_v22 = vsel %vm779_vm9, %v763_v17, 0 }
 0x1e6   : > { %v758_v21 = vsel %vm757_vm7, %v754_v15, %v756_v20 }
 0x1e7   : > { %3053 = vmatmul.mubr.msk.bf16.vlgmr.msra.gmra.mxu1 %vm698_vm0, %v3205_v16  ;;  %3055 = vmatprep.subr.msk.bf16.mxu0 %vm780_vm10, %v758_v21  ;;  %v901_v23 = vpop.permute.xlu0 %900 }
 0x1e8   : > { %v909_v25 = vsel %vm904_vm11, 0, %v901_v23  ;;  %872 = vmatpush1.bf16.msra.mxu0 %v781_v22  ;;  %972 = vmatprep.mubr.bf16.mxu1 %v3242_v2 }
 0x1e9   : > { %v903_v26 = vpop.permute.xlu1 %902  ;;  %v927_v28 = vsel %vm925_vm12, %v909_v25, 0 }
 0x1ea   : > { %v905_v27 = vsel %vm904_vm11, %v901_v23, %v903_v26 }
 0x1eb   : > { %3056 = vmatmul.mubr.msk.bf16.vlgmr.msra.gmra.mxu0 %vm698_vm0, %v3206_v24  ;;  %3060 = vmatprep.subr.msk.bf16.mxu1 %vm926_vm13, %v905_v27  ;;  %v988_v29 = vpop.permute.xlu0 %987 }
 0x1ec   : > { %v996_v31 = vsel %vm991_vm14, 0, %v988_v29  ;;  %955 = vmatpush1.bf16.msra.mxu1 %v927_v28  ;;  %1043 = vmatprep.mubr.bf16.mxu0 %v3242_v2 }
 0x1ed   : > { %v990_v32 = vpop.permute.xlu1 %989  ;;  %1083 = vmatprep.subr.bf16.mxu1 %v3408_v45  ;;  %v998_v34 = vsel %vm779_vm9, %v996_v31, 0 }
 0x1ee   : > { %v992_v33 = vsel %vm991_vm14, %v988_v29, %v990_v32 }
 0x1ef   : > { %3061 = vmatmul.mubr.msk.bf16.vlgmr.msra.gmra.mxu1 %vm698_vm0, %v3207_v30  ;;  %3065 = vmatprep.subr.msk.bf16.mxu0 %vm780_vm10, %v992_v33  ;;  %v1117_v35 = vpop.permute.xlu0 %1116 }
 0x1f0   : > { %1026 = vmatpush1.bf16.msra.mxu0 %v998_v34  ;;  %1084 = vmatpush1.bf16.msra.mxu1 %v3406_v43 }
 0x1f1   : > { %v1119_v37 = vpop.permute.xlu1 %1118  ;;  %1101 = vmatprep.mubr.bf16.mxu1 %v3242_v2 }
 0x1f2   : > { %v1121_v38 = vsel %vm1120_vm15, %v1117_v35, %v1119_v37  ;;  %v1125_v39 = vsel %vm1120_vm15, %v1119_v37, 0 }
 0x1f3   : > { %v1127_v40 = vsel %vm925_vm12, %v1121_v38, 0  ;;  %3066 = vmatmul.mubr.msk.bf16.vlgmr.msra.gmra.mxu0 %vm698_vm0, %v3208_v36  ;;  %3074 = vmatprep.subr.msk.bf16.mxu0 %vm926_vm13, %v1125_v39  ;;  %v1188_v41 = vpop.permute.xlu0 %1187 }
 0x1f4   : > { %1155 = vmatpush1.bf16.msra.mxu0 %v1127_v40  ;;  %1172 = vmatprep.mubr.bf16.mxu0 %v3242_v2 }
 0x1f5   : > { %v1190_v43 = vpop.permute.xlu1 %1189 }
 0x1f6   : > { %v1192_v44 = vsel %vm1191_vm1, %v1188_v41, %v1190_v43  ;;  %v1196_v45 = vsel %vm1191_vm1, %v1190_v43, 0 }
 0x1f7   : > { %v1198_v46 = vsel %vm779_vm9, %v1192_v44, 0  ;;  %3070 = vmatmul.mubr.msk.bf16.vlgmr.msra.gmra.mxu1 %vm698_vm0, %v3209_v42  ;;  %3079 = vmatprep.subr.msk.bf16.mxu1 %vm780_vm10, %v1196_v45  ;;  %v1259_v47 = vpop.permute.xlu0 %1258 }
 0x1f8   : > { %1226 = vmatpush1.bf16.msra.mxu1 %v1198_v46  ;;  %1243 = vmatprep.mubr.bf16.mxu1 %v3242_v2 }
 0x1f9   : > { %v1261_v49 = vpop.permute.xlu1 %1260 }
 0x1fa   : > { %v1263_v50 = vsel %vm1262_vm2, %v1259_v47, %v1261_v49  ;;  %3084 = vmatprep.subr.msk.bf16.mxu0 %vm1262_vm2, %v1261_v49 }
 0x1fb   : > { %3075 = vmatmul.mubr.msk.bf16.vlgmr.msra.gmra.mxu0 %vm698_vm0, %v3210_v48  ;;  %v1328_v52 = vpop.permute.xlu0 %1327 }
 0x1fc   : > { %1295 = vmatpush1.bf16.msra.mxu0 %v1263_v50  ;;  %1312 = vmatprep.mubr.bf16.mxu0 %v3242_v2 }
 0x1fd   : > { %v1330_v53 = vpop.permute.xlu1 %1329 }
 0x1fe   : > { %v1332_v54 = vsel %vm1331_vm3, %v1328_v52, %v1330_v53  ;;  %v1336_v55 = vsel %vm1331_vm3, %v1330_v53, 0 }
 0x1ff   : > { %v1338_v56 = vsel %vm925_vm12, %v1332_v54, 0  ;;  %3080 = vmatmul.mubr.msk.bf16.vlgmr.msra.gmra.mxu1 %vm698_vm0, %v3211_v51  ;;  %3089 = vmatprep.subr.msk.bf16.mxu1 %vm926_vm13, %v1336_v55 }
 0x200   : > { %1366 = vmatpush1.bf16.msra.mxu1 %v1338_v56  ;;  %1383 = vmatprep.mubr.bf16.mxu1 %v3242_v2 }
 0x203   : > { %3085 = vmatmul.mubr.msk.bf16.vlgmr.msra.gmra.mxu0 %vm698_vm0, %v3212_v57 }
 0x204   : > { %1545 = vmatprep.mubr.bf16.mxu0 %v3242_v2 }
 0x207   : > { %3090 = vmatmul.mubr.msk.bf16.vlgmr.msra.gmra.mxu1 %vm698_vm0, %v3213_v58 }
 0x208   : > { %v1431_v59 = vpop.permute.xlu0 %1430  ;;  %1629 = vmatprep.mubr.bf16.mxu1 %v3242_v2 }
 0x209   : > { %v1442_v63 = vmul.f32 %v1431_v59, %v3389_v7  ;;  %v1443_v0 = vmul.f32 %v1431_v59, %v3391_v8 }
 0x20a   : > { %v1436_v60 = vpop.permute.xlu1 %1435 }
 0x20b   : > { %v1444_v3 = vmul.f32 %v1436_v60, %v3395_v13  ;;  %v1445_v4 = vmul.f32 %v1436_v60, %v3397_v14 }
 0x20c   : > { %v3585_v61 = vpop.permute.xlu0 %1402 }
 0x20e   : > { %v3587_v62 = vpop.permute.xlu1 %1407 }
 0x210   : > { %v1463_v1 = vpop.permute.xlu0 %1462 }
 0x211   : > { %v1474_v9 = vadd.f32 %v1463_v1, %v1442_v63  ;;  %v1475_v11 = vadd.f32 %v1463_v1, %v1443_v0 }
 0x212   : > { %v1468_v12 = vpop.permute.xlu1 %1467 }
 0x213   : > { %v1476_v15 = vadd.f32 %v1468_v12, %v1444_v3  ;;  %v1477_v16 = vadd.f32 %v1468_v12, %v1445_v4  ;;  %v1482_v17 = vmax.f32 %v1474_v9, 0.0  ;;  %v1483_v20 = vmax.f32 %v1475_v11, 0.0 }
 0x215   : > { %v1484_v21 = vmax.f32 %v1476_v15, 0.0  ;;  %v1485_v22 = vmax.f32 %v1477_v16, 0.0 }
 0x217   : > { %v1488_v23 = vpack.c.bf16 %v1484_v21, %v1482_v17  ;;  %v1489_v24 = vpack.c.bf16 %v1485_v22, %v1483_v20 }
 0x219   : > { %1525 = vmatprep.subr.bf16.mxu0 %v1489_v24 }
 0x21a   : > { %1526 = vmatpush1.bf16.msra.mxu0 %v1488_v23 }
 0x2a7   : > { %v840_v25 = vpop.f32.mrf.mxu1 }
 0x2a9   : > { %v842_v26 = vpop.f32.mrf.mxu1 }
 0x2ab   : > { %v844_v27 = vpop.f32.mrf.mxu1  ;;  %v891_v28 = vpop.f32.mrf.mxu0 }
 0x2ac   : > { %v892_v43 = vadd.f32 %v891_v28, %v840_v25 }
 0x2ad   : > { %v846_v29 = vpop.f32.mrf.mxu1  ;;  %v893_v30 = vpop.f32.mrf.mxu0 }
 0x2ae   : > { %v894_v46 = vadd.f32 %v893_v30, %v842_v26 }
 0x2af   : > { %v895_v31 = vpop.f32.mrf.mxu0  ;;  %v974_v32 = vpop.f32.mrf.mxu1 }
 0x2b0   : > { %v983_v47 = vadd.f32 %v974_v32, %v892_v43  ;;  %v896_v50 = vadd.f32 %v895_v31, %v844_v27 }
 0x2b1   : > { %v897_v33 = vpop.f32.mrf.mxu0  ;;  %v976_v34 = vpop.f32.mrf.mxu1 }
 0x2b2   : > { %v984_v51 = vadd.f32 %v976_v34, %v894_v46  ;;  %v898_v55 = vadd.f32 %v897_v33, %v846_v29  ;;  %v1421_v33 = vpop.permute.xlu0 %1420 }
 0x2b3   : > { %v978_v35 = vpop.f32.mrf.mxu1  ;;  %v1045_v36 = vpop.f32.mrf.mxu0 }
 0x2b4   : > { %v1054_v52 = vadd.f32 %v1045_v36, %v983_v47  ;;  %v985_v56 = vadd.f32 %v978_v35, %v896_v50 }
 0x2b5   : > { %v980_v37 = vpop.f32.mrf.mxu1  ;;  %v1047_v38 = vpop.f32.mrf.mxu0 }
 0x2b6   : > { %v1055_v57 = vadd.f32 %v1047_v38, %v984_v51  ;;  %v986_v63 = vadd.f32 %v980_v37, %v898_v55  ;;  %v1426_v37 = vpop.permute.xlu1 %1425  ;;  %v1453_v50 = vpop.permute.xlu0 %1452 }
 0x2b7   : > { %v1049_v39 = vpop.f32.mrf.mxu0  ;;  %v1103_v40 = vpop.f32.mrf.mxu1 }
 0x2b8   : > { %v1112_v58 = vadd.f32 %v1103_v40, %v1054_v52  ;;  %v1056_v0 = vadd.f32 %v1049_v39, %v985_v56 }
 0x2b9   : > { %v1051_v41 = vpop.f32.mrf.mxu0  ;;  %v1105_v42 = vpop.f32.mrf.mxu1 }
 0x2ba   : > { %v1113_v1 = vadd.f32 %v1105_v42, %v1055_v57  ;;  %v1057_v11 = vadd.f32 %v1051_v41, %v986_v63  ;;  %v1458_v51 = vpop.permute.xlu1 %1457 }
 0x2bb   : > { %v1107_v44 = vpop.f32.mrf.mxu1  ;;  %v1174_v45 = vpop.f32.mrf.mxu0 }
 0x2bc   : > { %v1183_v3 = vadd.f32 %v1174_v45, %v1112_v58  ;;  %v1114_v12 = vadd.f32 %v1107_v44, %v1056_v0 }
 0x2bd   : > { %v1109_v48 = vpop.f32.mrf.mxu1  ;;  %v1176_v49 = vpop.f32.mrf.mxu0 }
 0x2be   : > { %v1184_v15 = vadd.f32 %v1176_v49, %v1113_v1  ;;  %v1115_v21 = vadd.f32 %v1109_v48, %v1057_v11  ;;  %v1497_v1 = vpop.permute.xlu0 %1496 }
 0x2bf   : > { %v1178_v53 = vpop.f32.mrf.mxu0  ;;  %v1245_v54 = vpop.f32.mrf.mxu1 }
 0x2c0   : > { %v1254_v16 = vadd.f32 %v1245_v54, %v1183_v3  ;;  %v1185_v22 = vadd.f32 %v1178_v53, %v1114_v12 }
 0x2c1   : > { %v1180_v59 = vpop.f32.mrf.mxu0  ;;  %v1247_v60 = vpop.f32.mrf.mxu1 }
 0x2c2   : > { %v1255_v23 = vadd.f32 %v1247_v60, %v1184_v15  ;;  %v1186_v27 = vadd.f32 %v1180_v59, %v1115_v21 }
 0x2c3   : > { %v1249_v4 = vpop.f32.mrf.mxu1  ;;  %v1314_v9 = vpop.f32.mrf.mxu0 }
 0x2c4   : > { %v1323_v24 = vadd.f32 %v1314_v9, %v1254_v16  ;;  %v1256_v28 = vadd.f32 %v1249_v4, %v1185_v22  ;;  %v1502_v9 = vpop.permute.xlu1 %1501 }
 0x2c5   : > { %v1251_v17 = vpop.f32.mrf.mxu1  ;;  %v1316_v20 = vpop.f32.mrf.mxu0 }
 0x2c6   : > { %v1324_v29 = vadd.f32 %v1316_v20, %v1255_v23  ;;  %v1257_v34 = vadd.f32 %v1251_v17, %v1186_v27  ;;  %v2182_v27 = vld [vmem:[%s3932_s13 + $0x28] sm:$0xff] }
 0x2c7   : > { %v1318_v25 = vpop.f32.mrf.mxu0  ;;  %v1385_v26 = vpop.f32.mrf.mxu1 }
 0x2c8   : > { %v1394_v30 = vadd.f32 %v1385_v26, %v1323_v24  ;;  %v1325_v35 = vadd.f32 %v1318_v25, %v1256_v28  ;;  %v2181_v26 = vld [vmem:[%s3932_s13 + $0x20] sm:$0xff] }
 0x2c9   : > { %v1320_v31 = vpop.f32.mrf.mxu0  ;;  %v1387_v32 = vpop.f32.mrf.mxu1  ;;  %v2229_v28 = vld [vmem:[%s3933_s14 + $0x20] sm:$0xff] }
 0x2ca   : > { %v1395_v36 = vadd.f32 %v1387_v32, %v1324_v29  ;;  %v3594_v38 = vadd.f32 %v3585_v61, %v1394_v30  ;;  %v1326_v40 = vadd.f32 %v1320_v31, %v1257_v34  ;;  %v2230_v29 = vld [vmem:[%s3933_s14 + $0x28] sm:$0xff]  ;;  %v2179_v30 = vld [vmem:[%s3932_s13 + $0x10] sm:$0xff]  ;;  %v2180_v31 = vld [vmem:[%s3932_s13 + $0x18] sm:$0xff] }
 0x2cb   : > { %v1389_v39 = vpop.f32.mrf.mxu1  ;;  %v2161_v32 = vld [vmem:[%s3931_s12] sm:$0xff]  ;;  %v2227_v34 = vld [vmem:[%s3933_s14 + $0x10] sm:$0xff] }
 0x2cc   : > { %v3597_v41 = vadd.f32 %v3585_v61, %v1395_v36  ;;  %v1396_v42 = vadd.f32 %v1389_v39, %v1325_v35  ;;  %v1438_v47 = vmul.f32 %v1421_v33, %v3594_v38  ;;  %v2228_v35 = vld [vmem:[%s3933_s14 + $0x18] sm:$0xff]  ;;  %v2177_v36 = vld [vmem:[%s3932_s13] sm:$0xff] }
 0x2cd   : > { %v1391_v43 = vpop.f32.mrf.mxu1  ;;  %v2225_v39 = vld [vmem:[%s3933_s14] sm:$0xff] }
 0x2ce   : > { %v1439_v44 = vmul.f32 %v1421_v33, %v3597_v41  ;;  %v3601_v45 = vadd.f32 %v3587_v62, %v1396_v42  ;;  %v1397_v46 = vadd.f32 %v1391_v43, %v1326_v40  ;;  %v1470_v54 = vadd.f32 %v1453_v50, %v1438_v47  ;;  %v2162_v33 = vld [vmem:[%s3931_s12 + $0x8] sm:$0xff]  ;;  %v2293_v42 = vld [vmem:[%s3935_s16] sm:$0xff] }
 0x2cf   : > { %v2226_v40 = vld [vmem:[%s3933_s14 + $0x8] sm:$0xff] }
 0x2d0   : > { %v1440_v48 = vmul.f32 %v1426_v37, %v3601_v45  ;;  %v3606_v49 = vadd.f32 %v3587_v62, %v1397_v46  ;;  %v1471_v53 = vadd.f32 %v1453_v50, %v1439_v44  ;;  %v1478_v59 = vmax.f32 %v1470_v54, 0.0  ;;  %v3214_v62 = vld [vmem:[%s3928_s9] sm:$0xff]   ;;  %v2294_v43 = vld [vmem:[%s3935_s16 + $0x8] sm:$0xff] }
 0x2d1   : > { %v3215_v50 = vld [vmem:[%s3930_s11 + $0x8] sm:$0xff]  }
 0x2d2   : > { %v1472_v52 = vadd.f32 %v1458_v51, %v1440_v48  ;;  %v1441_v61 = vmul.f32 %v1426_v37, %v3606_v49  ;;  %v1479_v57 = vmax.f32 %v1471_v53, 0.0  ;;  %v2178_v37 = vld [vmem:[%s3932_s13 + $0x8] sm:$0xff] }
 0x2d4   : > { %v1473_v55 = vadd.f32 %v1458_v51, %v1441_v61  ;;  %v1480_v56 = vmax.f32 %v1472_v52, 0.0 }
 0x2d6   : > { %v1481_v58 = vmax.f32 %v1473_v55, 0.0  ;;  %v1486_v63 = vpack.c.bf16 %v1480_v56, %v1478_v59  ;;  %v3216_v55 = vld [vmem:[%s3930_s11] sm:$0xff]  }
 0x2d8   : > { %v1487_v60 = vpack.c.bf16 %v1481_v58, %v1479_v57 }
 0x2da   : > { %1527 = vmatprep.subr.bf16.mxu0 %v1487_v60 }
 0x2db   : > { %1528 = vmatpush1.bf16.msra.mxu0 %v1486_v63  ;;  %v3217_v63 = vld [vmem:[%s3930_s11 + $0x10] sm:$0xff]  }
 0x2de   : > { %3092 = vmatmul.mubr.msk.bf16.vlgmr.msra.gmra.mxu0 %vm1509_vm4, %v3214_v62 }
 0x2df   : > { %1680 = vmatprep.mubr.bf16.mxu0 %v3242_v2 }
 0x39e   : > { %v1547_v0 = vpop.f32.mrf.mxu0 }
 0x39f   : > { %v1548_v4 = vadd.f32 %v1547_v0, %v1497_v1 }
 0x3a0   : > { %v1549_v3 = vpop.f32.mrf.mxu0 }
 0x3a1   : > { %v1550_v12 = vadd.f32 %v1549_v3, %v1497_v1  ;;  %v1556_v17 = vmax.f32 %v1548_v4, 0.0 }
 0x3a2   : > { %v1551_v11 = vpop.f32.mrf.mxu0 }
 0x3a3   : > { %v1552_v15 = vadd.f32 %v1551_v11, %v1502_v9  ;;  %v1557_v22 = vmax.f32 %v1550_v12, 0.0 }
 0x3a4   : > { %v1553_v16 = vpop.f32.mrf.mxu0 }
 0x3a5   : > { %v1558_v20 = vmax.f32 %v1552_v15, 0.0  ;;  %v1554_v21 = vadd.f32 %v1553_v16, %v1502_v9  ;;  %v3218_v9 = vld [vmem:[%s3930_s11 + $0x18] sm:$0xff]  }
 0x3a7   : > { %v3613_v23 = vpack.c.bf16 %v1558_v20, %v1556_v17  ;;  %v1559_v24 = vmax.f32 %v1554_v21, 0.0  ;;  %v3219_v20 = vld [vmem:[%s3930_s11 + $0x20] sm:$0xff]  }
 0x3a9   : > { %v3615_v25 = vpack.c.bf16 %v1559_v24, %v1557_v22  ;;  %1577 = vrot.lane.b32.xlu0 %v3613_v23, %s3956_s28 }
 0x3ab   : > { %1579 = vrot.lane.b32.xlu1 %v3615_v25, %s3956_s28  ;;  %s3986_s28 = smov 16  }
 0x3ad   : > { %1564 = vrot.lane.b32.xlu0 %v3613_v23, %s3979_s22 }
 0x3af   : > { %1566 = vrot.lane.b32.xlu1 %v3615_v25, %s3979_s22 }
 0x3b1   : > { %1691 = vrot.lane.b32.xlu0 %v3613_v23, %s3980_s2 }
 0x3b3   : > { %1693 = vrot.lane.b32.xlu1 %v3615_v25, %s3980_s2 }
 0x3b5   : > { %1760 = vrot.lane.b32.xlu0 %v3613_v23, %s3981_s20 }
 0x3b7   : > { %1762 = vrot.lane.b32.xlu1 %v3615_v25, %s3981_s20 }
 0x3b9   : > { %1887 = vrot.lane.b32.xlu0 %v3613_v23, %s3982_s25 }
 0x3bb   : > { %1889 = vrot.lane.b32.xlu1 %v3615_v25, %s3982_s25 }
 0x3bd   : > { %1956 = vrot.lane.b32.xlu0 %v3613_v23, %s3983_s26 }
 0x3bf   : > { %1958 = vrot.lane.b32.xlu1 %v3615_v25, %s3983_s26 }
 0x3c1   : > { %2025 = vrot.lane.b32.xlu0 %v3613_v23, %s3984_s27 }
 0x3c3   : > { %2027 = vrot.lane.b32.xlu1 %v3615_v25, %s3984_s27 }
 0x3c5   : > { %2092 = vrot.lane.b32.xlu0 %v3613_v23, %s3985_s29 }
 0x3c7   : > { %2094 = vrot.lane.b32.xlu1 %v3615_v25, %s3985_s29 }
 0x3c9   : > { %2205 = vperm.xlu0 %3202, %v2181_v26   ;;  %v3220_v26 = vld [vmem:[%s3930_s11 + $0x28] sm:$0xff]  }
 0x3cb   : > { %2210 = vperm.xlu1 %3203, %v2182_v27  }
 0x3cd   : > { %2253 = vperm.xlu0 %3202, %v2229_v28  }
 0x3cf   : > { %2258 = vperm.xlu1 %3203, %v2230_v29   ;;  %v3221_v29 = vld [vmem:[%s3930_s11 + $0x30] sm:$0xff]  }
 0x3d1   : > { %2195 = vperm.xlu0 %3202, %v2179_v30  }
 0x3d3   : > { %2200 = vperm.xlu1 %3203, %v2180_v31  }
 0x3d5   : > { %2165 = vperm.xlu0 %3202, %v2161_v32  }
 0x3d7   : > { %2170 = vperm.xlu1 %3203, %v2162_v33  }
 0x3d9   : > { %2243 = vperm.xlu0 %3202, %v2227_v34  }
 0x3db   : > { %2248 = vperm.xlu1 %3203, %v2228_v35   ;;  %v3222_v35 = vld [vmem:[%s3930_s11 + $0x38] sm:$0xff]  }
 0x3dd   : > { %2185 = vperm.xlu0 %3202, %v2177_v36   ;;  %v3223_v36 = vld [vmem:[%s3930_s11 + $0x40] sm:$0xff]  }
 0x3df   : > { %2190 = vperm.xlu1 %3203, %v2178_v37  }
 0x3e1   : > { %2233 = vperm.xlu0 %3202, %v2225_v39  }
 0x3e3   : > { %2238 = vperm.xlu1 %3203, %v2226_v40  }
 0x3e5   : > { %2297 = vperm.xlu0 %3202, %v2293_v42  }
 0x3e7   : > { %2302 = vperm.xlu1 %3203, %v2294_v43  }
 0x41b   : > { %v1578_v44 = vpop.permute.xlu0 %1577 }
 0x41d   : > { %v1580_v46 = vpop.permute.xlu1 %1579 }
 0x41e   : > { %v1581_v47 = vsel %vm698_vm0, %v1578_v44, %v1580_v46 }
 0x41f   : > { %1611 = vmatprep.subr.bf16.mxu1 %v1581_v47  ;;  %v1565_v48 = vpop.permute.xlu0 %1564 }
 0x420   : > { %v1571_v51 = vsel %vm757_vm7, 0, %v1565_v48  ;;  %3097 = vmatpush1.bf16.msk.msra.mxu1 %vm3484_vm8, %v1578_v44 }
 0x421   : > { %v1567_v52 = vpop.permute.xlu1 %1566  ;;  %v1573_v53 = vsel %vm779_vm9, %v1571_v51, 0 }
 0x422   : > { %v1568_v61 = vsel %vm757_vm7, %v1565_v48, %v1567_v52 }
 0x423   : > { %3098 = vmatmul.mubr.msk.bf16.vlgmr.msra.gmra.mxu1 %vm698_vm0, %v3215_v50  ;;  %3100 = vmatprep.subr.msk.bf16.mxu0 %vm780_vm10, %v1568_v61  ;;  %v1692_v54 = vpop.permute.xlu0 %1691 }
 0x424   : > { %v1698_v56 = vsel %vm904_vm11, 0, %v1692_v54  ;;  %1663 = vmatpush1.bf16.msra.mxu0 %v1573_v53  ;;  %1745 = vmatprep.mubr.bf16.mxu1 %v3242_v2 }
 0x425   : > { %v1694_v57 = vpop.permute.xlu1 %1693  ;;  %v1700_v59 = vsel %vm925_vm12, %v1698_v56, 0 }
 0x426   : > { %v1695_v58 = vsel %vm904_vm11, %v1692_v54, %v1694_v57 }
 0x427   : > { %3101 = vmatmul.mubr.msk.bf16.vlgmr.msra.gmra.mxu0 %vm698_vm0, %v3216_v55  ;;  %3105 = vmatprep.subr.msk.bf16.mxu1 %vm926_vm13, %v1695_v58  ;;  %v1761_v60 = vpop.permute.xlu0 %1760 }
 0x428   : > { %v1767_v62 = vsel %vm991_vm14, 0, %v1761_v60  ;;  %1728 = vmatpush1.bf16.msra.mxu1 %v1700_v59  ;;  %1814 = vmatprep.mubr.bf16.mxu0 %v3242_v2 }
 0x429   : > { %v1763_v0 = vpop.permute.xlu1 %1762  ;;  %1854 = vmatprep.subr.bf16.mxu1 %v3615_v25  ;;  %v1769_v3 = vsel %vm779_vm9, %v1767_v62, 0 }
 0x42a   : > { %v1764_v1 = vsel %vm991_vm14, %v1761_v60, %v1763_v0 }
 0x42b   : > { %3106 = vmatmul.mubr.msk.bf16.vlgmr.msra.gmra.mxu1 %vm698_vm0, %v3217_v63  ;;  %3110 = vmatprep.subr.msk.bf16.mxu0 %vm780_vm10, %v1764_v1  ;;  %v1888_v4 = vpop.permute.xlu0 %1887 }
 0x42c   : > { %1797 = vmatpush1.bf16.msra.mxu0 %v1769_v3  ;;  %1855 = vmatpush1.bf16.msra.mxu1 %v3613_v23 }
 0x42d   : > { %v1890_v11 = vpop.permute.xlu1 %1889  ;;  %1872 = vmatprep.mubr.bf16.mxu1 %v3242_v2 }
 0x42e   : > { %v1891_v12 = vsel %vm1120_vm15, %v1888_v4, %v1890_v11  ;;  %v1894_v15 = vsel %vm1120_vm15, %v1890_v11, 0 }
 0x42f   : > { %v1896_v16 = vsel %vm925_vm12, %v1891_v12, 0  ;;  %3111 = vmatmul.mubr.msk.bf16.vlgmr.msra.gmra.mxu0 %vm698_vm0, %v3218_v9  ;;  %3119 = vmatprep.subr.msk.bf16.mxu0 %vm926_vm13, %v1894_v15  ;;  %v1957_v17 = vpop.permute.xlu0 %1956 }
 0x430   : > { %1924 = vmatpush1.bf16.msra.mxu0 %v1896_v16  ;;  %1941 = vmatprep.mubr.bf16.mxu0 %v3242_v2 }
 0x431   : > { %v1959_v21 = vpop.permute.xlu1 %1958 }
 0x432   : > { %v1960_v22 = vsel %vm1191_vm1, %v1957_v17, %v1959_v21  ;;  %v1963_v23 = vsel %vm1191_vm1, %v1959_v21, 0 }
 0x433   : > { %v1965_v24 = vsel %vm779_vm9, %v1960_v22, 0  ;;  %3115 = vmatmul.mubr.msk.bf16.vlgmr.msra.gmra.mxu1 %vm698_vm0, %v3219_v20  ;;  %3124 = vmatprep.subr.msk.bf16.mxu1 %vm780_vm10, %v1963_v23  ;;  %v2026_v25 = vpop.permute.xlu0 %2025 }
 0x434   : > { %1993 = vmatpush1.bf16.msra.mxu1 %v1965_v24  ;;  %2010 = vmatprep.mubr.bf16.mxu1 %v3242_v2 }
 0x435   : > { %v2028_v27 = vpop.permute.xlu1 %2027 }
 0x436   : > { %v2029_v28 = vsel %vm1262_vm2, %v2026_v25, %v2028_v27  ;;  %3129 = vmatprep.subr.msk.bf16.mxu0 %vm1262_vm2, %v2028_v27 }
 0x437   : > { %3120 = vmatmul.mubr.msk.bf16.vlgmr.msra.gmra.mxu0 %vm698_vm0, %v3220_v26  ;;  %v2093_v30 = vpop.permute.xlu0 %2092 }
 0x438   : > { %2060 = vmatpush1.bf16.msra.mxu0 %v2029_v28  ;;  %2077 = vmatprep.mubr.bf16.mxu0 %v3242_v2 }
 0x439   : > { %v2095_v31 = vpop.permute.xlu1 %2094 }
 0x43a   : > { %v2096_v32 = vsel %vm1331_vm3, %v2093_v30, %v2095_v31  ;;  %v2099_v33 = vsel %vm1331_vm3, %v2095_v31, 0 }
 0x43b   : > { %v2101_v34 = vsel %vm925_vm12, %v2096_v32, 0  ;;  %3125 = vmatmul.mubr.msk.bf16.vlgmr.msra.gmra.mxu1 %vm698_vm0, %v3221_v29  ;;  %3134 = vmatprep.subr.msk.bf16.mxu1 %vm926_vm13, %v2099_v33 }
 0x43c   : > { %2129 = vmatpush1.bf16.msra.mxu1 %v2101_v34  ;;  %2146 = vmatprep.mubr.bf16.mxu1 %v3242_v2 }
 0x43f   : > { %3130 = vmatmul.mubr.msk.bf16.vlgmr.msra.gmra.mxu0 %vm698_vm0, %v3222_v35 }
 0x440   : > { %2346 = vmatprep.mubr.bf16.mxu0 %v3242_v2 }
 0x443   : > { %3135 = vmatmul.mubr.msk.bf16.vlgmr.msra.gmra.mxu1 %vm698_vm0, %v3223_v36 }
 0x444   : > { %v2206_v37 = vpop.permute.xlu0 %2205  ;;  %2430 = vmatprep.mubr.bf16.mxu1 %v3242_v2 }
 0x445   : > { %v2221_v40 = vmul.f32 %v2206_v37, %v3389_v7  ;;  %v2222_v42 = vmul.f32 %v2206_v37, %v3391_v8 }
 0x446   : > { %v2211_v39 = vpop.permute.xlu1 %2210 }
 0x447   : > { %v2223_v44 = vmul.f32 %v2211_v39, %v3395_v13  ;;  %v2224_v46 = vmul.f32 %v2211_v39, %v3397_v14 }
 0x448   : > { %v2254_v43 = vpop.permute.xlu0 %2253 }
 0x449   : > { %v2269_v47 = vadd.f32 %v2254_v43, %v2221_v40  ;;  %v2270_v48 = vadd.f32 %v2254_v43, %v2222_v42 }
 0x44a   : > { %v2259_v50 = vpop.permute.xlu1 %2258 }
 0x44b   : > { %v2271_v51 = vadd.f32 %v2259_v50, %v2223_v44  ;;  %v2272_v52 = vadd.f32 %v2259_v50, %v2224_v46  ;;  %v2281_v53 = vmax.f32 %v2269_v47, 0.0  ;;  %v2282_v54 = vmax.f32 %v2270_v48, 0.0 }
 0x44c   : > { %v2196_v61 = vpop.permute.xlu0 %2195 }
 0x44d   : > { %v2283_v55 = vmax.f32 %v2271_v51, 0.0  ;;  %v2284_v56 = vmax.f32 %v2272_v52, 0.0  ;;  %v2217_v13 = vmul.f32 %v2196_v61, %v3594_v38  ;;  %v2218_v14 = vmul.f32 %v2196_v61, %v3597_v41 }
 0x44e   : > { %v2201_v57 = vpop.permute.xlu1 %2200 }
 0x44f   : > { %v2289_v58 = vpack.c.bf16 %v2283_v55, %v2281_v53  ;;  %v2290_v7 = vpack.c.bf16 %v2284_v56, %v2282_v54  ;;  %v2219_v63 = vmul.f32 %v2201_v57, %v3601_v45  ;;  %v2220_v62 = vmul.f32 %v2201_v57, %v3606_v49 }
 0x450   : > { %v3789_v59 = vpop.permute.xlu0 %2165 }
 0x451   : > { %2324 = vmatprep.subr.bf16.mxu0 %v2290_v7 }
 0x452   : > { %v3791_v8 = vpop.permute.xlu1 %2170  ;;  %2325 = vmatpush1.bf16.msra.mxu0 %v2289_v58 }
 0x454   : > { %v2244_v60 = vpop.permute.xlu0 %2243 }
 0x455   : > { %v2265_v0 = vadd.f32 %v2244_v60, %v2217_v13  ;;  %v2266_v1 = vadd.f32 %v2244_v60, %v2218_v14 }
 0x456   : > { %v2249_v3 = vpop.permute.xlu1 %2248 }
 0x457   : > { %v2267_v4 = vadd.f32 %v2249_v3, %v2219_v63  ;;  %v2268_v9 = vadd.f32 %v2249_v3, %v2220_v62  ;;  %v2277_v11 = vmax.f32 %v2265_v0, 0.0  ;;  %v2278_v12 = vmax.f32 %v2266_v1, 0.0 }
 0x459   : > { %v2279_v15 = vmax.f32 %v2267_v4, 0.0  ;;  %v2280_v16 = vmax.f32 %v2268_v9, 0.0 }
 0x45b   : > { %v2287_v17 = vpack.c.bf16 %v2279_v15, %v2277_v11  ;;  %v2288_v20 = vpack.c.bf16 %v2280_v16, %v2278_v12 }
 0x45d   : > { %2326 = vmatprep.subr.bf16.mxu0 %v2288_v20 }
 0x45e   : > { %2327 = vmatpush1.bf16.msra.mxu0 %v2287_v17 }
 0x4e3   : > { %v1631_v38 = vpop.f32.mrf.mxu1 }
 0x4e5   : > { %v1633_v41 = vpop.f32.mrf.mxu1 }
 0x4e7   : > { %v1635_v21 = vpop.f32.mrf.mxu1  ;;  %v1682_v22 = vpop.f32.mrf.mxu0 }
 0x4e8   : > { %v1683_v35 = vadd.f32 %v1682_v22, %v1631_v38 }
 0x4e9   : > { %v1637_v45 = vpop.f32.mrf.mxu1  ;;  %v1684_v23 = vpop.f32.mrf.mxu0 }
 0x4ea   : > { %v1685_v39 = vadd.f32 %v1684_v23, %v1633_v41 }
 0x4eb   : > { %v1686_v49 = vpop.f32.mrf.mxu0  ;;  %v1747_v24 = vpop.f32.mrf.mxu1 }
 0x4ec   : > { %v1756_v40 = vadd.f32 %v1747_v24, %v1683_v35  ;;  %v1687_v44 = vadd.f32 %v1686_v49, %v1635_v21 }
 0x4ed   : > { %v1688_v25 = vpop.f32.mrf.mxu0  ;;  %v1749_v26 = vpop.f32.mrf.mxu1 }
 0x4ee   : > { %v1757_v46 = vadd.f32 %v1749_v26, %v1685_v39  ;;  %v1689_v51 = vadd.f32 %v1688_v25, %v1637_v45  ;;  %v2186_v45 = vpop.permute.xlu0 %2185  ;;  %v2191_v25 = vpop.permute.xlu1 %2190 }
 0x4ef   : > { %v1751_v27 = vpop.f32.mrf.mxu1  ;;  %v1816_v28 = vpop.f32.mrf.mxu0 }
 0x4f0   : > { %v1825_v47 = vadd.f32 %v1816_v28, %v1756_v40  ;;  %v1758_v52 = vadd.f32 %v1751_v27, %v1687_v44 }
 0x4f1   : > { %v1753_v29 = vpop.f32.mrf.mxu1  ;;  %v1818_v30 = vpop.f32.mrf.mxu0 }
 0x4f2   : > { %v1826_v61 = vadd.f32 %v1818_v30, %v1757_v46  ;;  %v1759_v56 = vadd.f32 %v1753_v29, %v1689_v51  ;;  %v2234_v39 = vpop.permute.xlu0 %2233  ;;  %v2239_v40 = vpop.permute.xlu1 %2238 }
 0x4f3   : > { %v1820_v31 = vpop.f32.mrf.mxu0  ;;  %v1874_v32 = vpop.f32.mrf.mxu1 }
 0x4f4   : > { %v1883_v53 = vadd.f32 %v1874_v32, %v1825_v47  ;;  %v1827_v57 = vadd.f32 %v1820_v31, %v1758_v52 }
 0x4f5   : > { %v1822_v33 = vpop.f32.mrf.mxu0  ;;  %v1876_v34 = vpop.f32.mrf.mxu1 }
 0x4f6   : > { %v1884_v58 = vadd.f32 %v1876_v34, %v1826_v61  ;;  %v1828_v60 = vadd.f32 %v1822_v33, %v1759_v56 }
 0x4f7   : > { %v1878_v36 = vpop.f32.mrf.mxu1  ;;  %v1943_v37 = vpop.f32.mrf.mxu0 }
 0x4f8   : > { %v1952_v7 = vadd.f32 %v1943_v37, %v1883_v53  ;;  %v1885_v63 = vadd.f32 %v1878_v36, %v1827_v57  ;;  %v3224_v53 = vld [vmem:[%s3934_s15] sm:$0xff]   ;;  %v2303_v57 = vpop.permute.xlu1 %2302 }
 0x4f9   : > { %v1880_v42 = vpop.f32.mrf.mxu1  ;;  %v1945_v43 = vpop.f32.mrf.mxu0 }
 0x4fa   : > { %v1953_v62 = vadd.f32 %v1945_v43, %v1884_v58  ;;  %v1886_v4 = vadd.f32 %v1880_v42, %v1828_v60 }
 0x4fb   : > { %v1947_v48 = vpop.f32.mrf.mxu0  ;;  %v2012_v50 = vpop.f32.mrf.mxu1 }
 0x4fc   : > { %v2021_v0 = vadd.f32 %v2012_v50, %v1952_v7  ;;  %v1954_v9 = vadd.f32 %v1947_v48, %v1885_v63 }
 0x4fd   : > { %v1949_v54 = vpop.f32.mrf.mxu0  ;;  %v2014_v55 = vpop.f32.mrf.mxu1 }
 0x4fe   : > { %v2022_v11 = vadd.f32 %v2014_v55, %v1953_v62  ;;  %v1955_v17 = vadd.f32 %v1949_v54, %v1886_v4  ;;  %v2298_v54 = vpop.permute.xlu0 %2297 }
 0x4ff   : > { %v2016_v13 = vpop.f32.mrf.mxu1  ;;  %v2079_v14 = vpop.f32.mrf.mxu0 }
 0x500   : > { %v2088_v12 = vadd.f32 %v2079_v14, %v2021_v0  ;;  %v2023_v20 = vadd.f32 %v2016_v13, %v1954_v9  ;;  %v2962_v9 = vld [vmem:[%s3937_s18] sm:$0xff] }
 0x501   : > { %v2018_v1 = vpop.f32.mrf.mxu1  ;;  %v2081_v3 = vpop.f32.mrf.mxu0 }
 0x502   : > { %v2089_v38 = vadd.f32 %v2081_v3, %v2022_v11  ;;  %v2024_v23 = vadd.f32 %v2018_v1, %v1955_v17  ;;  %v2963_v11 = vld [vmem:[%s3937_s18 + $0x8] sm:$0xff] }
 0x503   : > { %v2083_v15 = vpop.f32.mrf.mxu0  ;;  %v2148_v16 = vpop.f32.mrf.mxu1 }
 0x504   : > { %v2157_v41 = vadd.f32 %v2148_v16, %v2088_v12  ;;  %v2090_v49 = vadd.f32 %v2083_v15, %v2023_v20  ;;  %v3225_v20 = vld [vmem:[%s3936_s17 + $0x8] sm:$0xff]  }
 0x505   : > { %v2085_v21 = vpop.f32.mrf.mxu0  ;;  %v2150_v22 = vpop.f32.mrf.mxu1 }
 0x506   : > { %v2158_v24 = vadd.f32 %v2150_v22, %v2089_v38  ;;  %v2173_v26 = vadd.f32 %v3789_v59, %v2157_v41  ;;  %v2091_v28 = vadd.f32 %v2085_v21, %v2024_v23 }
 0x507   : > { %v2152_v27 = vpop.f32.mrf.mxu1 }
 0x508   : > { %v2174_v29 = vadd.f32 %v3789_v59, %v2158_v24  ;;  %v2159_v30 = vadd.f32 %v2152_v27, %v2090_v49  ;;  %v2213_v35 = vmul.f32 %v2186_v45, %v2173_v26  ;;  %v3226_v26 = vld [vmem:[%s3936_s17] sm:$0xff]  }
 0x509   : > { %v2154_v31 = vpop.f32.mrf.mxu1 }
 0x50a   : > { %v2214_v32 = vmul.f32 %v2186_v45, %v2174_v29  ;;  %v2175_v33 = vadd.f32 %v3791_v8, %v2159_v30  ;;  %v2160_v34 = vadd.f32 %v2154_v31, %v2091_v28  ;;  %v2261_v46 = vadd.f32 %v2234_v39, %v2213_v35  ;;  %v3227_v28 = vld [vmem:[%s3936_s17 + $0x10] sm:$0xff]  }
 0x50c   : > { %v2215_v36 = vmul.f32 %v2191_v25, %v2175_v33  ;;  %v2176_v37 = vadd.f32 %v3791_v8, %v2160_v34  ;;  %v2262_v44 = vadd.f32 %v2234_v39, %v2214_v32  ;;  %v2273_v51 = vmax.f32 %v2261_v46, 0.0  ;;  %v3229_v39 = vld [vmem:[%s3936_s17 + $0x20] sm:$0xff]  }
 0x50e   : > { %v2263_v42 = vadd.f32 %v2239_v40, %v2215_v36  ;;  %v2216_v43 = vmul.f32 %v2191_v25, %v2176_v37  ;;  %v2274_v50 = vmax.f32 %v2262_v44, 0.0  ;;  %v3228_v36 = vld [vmem:[%s3936_s17 + $0x18] sm:$0xff]  }
 0x510   : > { %v2264_v47 = vadd.f32 %v2239_v40, %v2216_v43  ;;  %v2275_v48 = vmax.f32 %v2263_v42, 0.0 }
 0x512   : > { %v2276_v59 = vmax.f32 %v2264_v47, 0.0  ;;  %v2285_v61 = vpack.c.bf16 %v2275_v48, %v2273_v51 }
 0x514   : > { %v2286_v52 = vpack.c.bf16 %v2276_v59, %v2274_v50 }
 0x516   : > { %2328 = vmatprep.subr.bf16.mxu0 %v2286_v52 }
 0x517   : > { %2329 = vmatpush1.bf16.msra.mxu0 %v2285_v61 }
 0x51a   : > { %3137 = vmatmul.mubr.msk.bf16.vlgmr.msra.gmra.mxu0 %vm2310_vm5, %v3224_v53 }
 0x51b   : > { %2546 = vmatprep.mubr.bf16.mxu0 %v3242_v2 }
 0x5da   : > { %v2348_v8 = vpop.f32.mrf.mxu0 }
 0x5db   : > { %v2349_v56 = vadd.f32 %v2348_v8, %v2298_v54  ;;  %v3232_v8 = vld [vmem:[%s3936_s17 + $0x38] sm:$0xff]  }
 0x5dc   : > { %v2350_v55 = vpop.f32.mrf.mxu0 }
 0x5dd   : > { %v2351_v7 = vadd.f32 %v2350_v55, %v2298_v54  ;;  %v2357_v60 = vmax.f32 %v2349_v56, 0.0 }
 0x5de   : > { %v2352_v58 = vpop.f32.mrf.mxu0 }
 0x5df   : > { %v2353_v13 = vadd.f32 %v2352_v58, %v2303_v57  ;;  %v2358_v0 = vmax.f32 %v2351_v7, 0.0 }
 0x5e0   : > { %v2354_v14 = vpop.f32.mrf.mxu0 }
 0x5e1   : > { %v2359_v63 = vmax.f32 %v2353_v13, 0.0  ;;  %v2355_v62 = vadd.f32 %v2354_v14, %v2303_v57 }
 0x5e3   : > { %v2361_v1 = vpack.c.bf16 %v2359_v63, %v2357_v60  ;;  %v2360_v3 = vmax.f32 %v2355_v62, 0.0 }
 0x5e5   : > { %v2362_v4 = vpack.c.bf16 %v2360_v3, %v2358_v0  ;;  %2378 = vrot.lane.b32.xlu0 %v2361_v1, %s3986_s28 }
 0x5e7   : > { %2380 = vrot.lane.b32.xlu1 %v2362_v4, %s3986_s28 }
 0x5e9   : > { %2365 = vrot.lane.b32.xlu0 %v2361_v1, %s3979_s22 }
 0x5eb   : > { %2367 = vrot.lane.b32.xlu1 %v2362_v4, %s3979_s22 }
 0x5ed   : > { %2492 = vrot.lane.b32.xlu0 %v2361_v1, %s3980_s2 }
 0x5ef   : > { %2494 = vrot.lane.b32.xlu1 %v2362_v4, %s3980_s2 }
 0x5f1   : > { %2561 = vrot.lane.b32.xlu0 %v2361_v1, %s3981_s20 }
 0x5f3   : > { %2563 = vrot.lane.b32.xlu1 %v2362_v4, %s3981_s20 }
 0x5f5   : > { %2688 = vrot.lane.b32.xlu0 %v2361_v1, %s3982_s25 }
 0x5f7   : > { %2690 = vrot.lane.b32.xlu1 %v2362_v4, %s3982_s25 }
 0x5f9   : > { %2757 = vrot.lane.b32.xlu0 %v2361_v1, %s3983_s26 }
 0x5fb   : > { %2759 = vrot.lane.b32.xlu1 %v2362_v4, %s3983_s26  ;;  %s3987_s26 = sshll.u32 %s3989_s30, 5 }
 0x5fc   : > { %s602_s4 = scalar_lea.vmem %s3938_s19, %s3987_s26 }
 0x5fd   : > { %2826 = vrot.lane.b32.xlu0 %v2361_v1, %s3984_s27 }
 0x5ff   : > { %2828 = vrot.lane.b32.xlu1 %v2362_v4, %s3984_s27 }
 0x601   : > { %2893 = vrot.lane.b32.xlu0 %v2361_v1, %s3985_s29 }
 0x603   : > { %2895 = vrot.lane.b32.xlu1 %v2362_v4, %s3985_s29 }
 0x605   : > { %2966 = vperm.xlu0 %3202, %v2962_v9  }
 0x607   : > { %2971 = vperm.xlu1 %3203, %v2963_v11  }
 0x657   : > { %v2379_v12 = vpop.permute.xlu0 %2378 }
 0x659   : > { %v2381_v15 = vpop.permute.xlu1 %2380 }
 0x65a   : > { %v2382_v16 = vsel %vm698_vm0, %v2379_v12, %v2381_v15 }
 0x65b   : > { %2412 = vmatprep.subr.bf16.mxu1 %v2382_v16  ;;  %v2366_v17 = vpop.permute.xlu0 %2365 }
 0x65c   : > { %v2372_v38 = vsel %vm757_vm7, 0, %v2366_v17  ;;  %3142 = vmatpush1.bf16.msk.msra.mxu1 %vm3484_vm8, %v2379_v12 }
 0x65d   : > { %v2368_v41 = vpop.permute.xlu1 %2367  ;;  %v2374_v22 = vsel %vm779_vm9, %v2372_v38, 0 }
 0x65e   : > { %v2369_v21 = vsel %vm757_vm7, %v2366_v17, %v2368_v41 }
 0x65f   : > { %3143 = vmatmul.mubr.msk.bf16.vlgmr.msra.gmra.mxu1 %vm698_vm0, %v3225_v20  ;;  %3145 = vmatprep.subr.msk.bf16.mxu1 %vm780_vm10, %v2369_v21  ;;  %v2493_v45 = vpop.permute.xlu0 %2492 }
 0x660   : > { %v2499_v23 = vsel %vm904_vm11, 0, %v2493_v45  ;;  %2464 = vmatpush1.bf16.msra.mxu1 %v2374_v22  ;;  %2481 = vmatprep.mubr.bf16.mxu1 %v3242_v2 }
 0x661   : > { %v2495_v49 = vpop.permute.xlu1 %2494  ;;  %v2501_v24 = vsel %vm925_vm12, %v2499_v23, 0 }
 0x662   : > { %v2496_v10 = vsel %vm904_vm11, %v2493_v45, %v2495_v49 }
 0x663   : > { %3150 = vmatprep.subr.msk.bf16.mxu0 %vm926_vm13, %v2496_v10  ;;  %v2562_v25 = vpop.permute.xlu0 %2561 }
 0x664   : > { %v2568_v27 = vsel %vm991_vm14, 0, %v2562_v25  ;;  %2529 = vmatpush1.bf16.msra.mxu0 %v2501_v24 }
 0x665   : > { %v2564_v29 = vpop.permute.xlu1 %2563  ;;  %2655 = vmatprep.subr.bf16.mxu0 %v2362_v4  ;;  %v2570_v31 = vsel %vm779_vm9, %v2568_v27, 0 }
 0x666   : > { %v2565_v30 = vsel %vm991_vm14, %v2562_v25, %v2564_v29 }
 0x667   : > { %3146 = vmatmul.mubr.msk.bf16.vlgmr.msra.gmra.mxu1 %vm698_vm0, %v3226_v26  ;;  %3155 = vmatprep.subr.msk.bf16.mxu1 %vm780_vm10, %v2565_v30  ;;  %v2689_v32 = vpop.permute.xlu0 %2688 }
 0x668   : > { %3151 = vmatmul.mubr.msk.bf16.vlgmr.msra.gmra.mxu0 %vm698_vm0, %v3227_v28  ;;  %2598 = vmatpush1.bf16.msra.mxu1 %v2570_v31 }
 0x669   : > { %2656 = vmatpush1.bf16.msra.mxu0 %v2361_v1  ;;  %v2691_v33 = vpop.permute.xlu1 %2690  ;;  %2615 = vmatprep.mubr.bf16.mxu1 %v3242_v2 }
 0x66a   : > { %v2695_v34 = vsel %vm1120_vm15, %v2691_v33, 0  ;;  %2673 = vmatprep.mubr.bf16.mxu0 %v3242_v2  ;;  %v2692_v37 = vsel %vm1120_vm15, %v2689_v32, %v2691_v33 }
 0x66b   : > { %3164 = vmatprep.subr.msk.bf16.mxu1 %vm926_vm13, %v2695_v34  ;;  %v2758_v35 = vpop.permute.xlu0 %2757  ;;  %v2697_v44 = vsel %vm925_vm12, %v2692_v37, 0 }
 0x66d   : > { %v2760_v40 = vpop.permute.xlu1 %2759 }
 0x66e   : > { %v2761_v42 = vsel %vm1191_vm1, %v2758_v35, %v2760_v40  ;;  %v2764_v43 = vsel %vm1191_vm1, %v2760_v40, 0 }
 0x66f   : > { %v2766_v46 = vsel %vm779_vm9, %v2761_v42, 0  ;;  %3156 = vmatmul.mubr.msk.bf16.vlgmr.msra.gmra.mxu1 %vm698_vm0, %v3228_v36  ;;  %3169 = vmatprep.subr.msk.bf16.mxu0 %vm780_vm10, %v2764_v43  ;;  %v2827_v47 = vpop.permute.xlu0 %2826 }
 0x670   : > { %2725 = vmatpush1.bf16.msra.mxu1 %v2697_v44  ;;  %3160 = vmatmul.mubr.msk.bf16.vlgmr.msra.gmra.mxu0 %vm698_vm0, %v3229_v39 }
 0x671   : > { %2794 = vmatpush1.bf16.msra.mxu0 %v2766_v46  ;;  %v2829_v48 = vpop.permute.xlu1 %2828  ;;  %2742 = vmatprep.mubr.bf16.mxu1 %v3242_v2 }
 0x672   : > { %3174 = vmatprep.subr.msk.bf16.mxu1 %vm1262_vm2, %v2829_v48  ;;  %2811 = vmatprep.mubr.bf16.mxu0 %v3242_v2  ;;  %v2830_v61 = vsel %vm1262_vm2, %v2827_v47, %v2829_v48 }
 0x673   : > { %v2894_v50 = vpop.permute.xlu0 %2893 }
 0x675   : > { %v2896_v59 = vpop.permute.xlu1 %2895 }
 0x676   : > { %v2897_v51 = vsel %vm1331_vm3, %v2894_v50, %v2896_v59  ;;  %v2900_v52 = vsel %vm1331_vm3, %v2896_v59, 0 }
 0x677   : > { %v2902_v53 = vsel %vm925_vm12, %v2897_v51, 0  ;;  %3165 = vmatmul.mubr.msk.bf16.vlgmr.msra.gmra.mxu1 %vm698_vm0, %v3230_v5  ;;  %3179 = vmatprep.subr.msk.bf16.mxu0 %vm926_vm13, %v2900_v52 }
 0x678   : > { %2861 = vmatpush1.bf16.msra.mxu1 %v2830_v61  ;;  %3170 = vmatmul.mubr.msk.bf16.vlgmr.msra.gmra.mxu0 %vm698_vm0, %v3231_v6 }
 0x679   : > { %2930 = vmatpush1.bf16.msra.mxu0 %v2902_v53  ;;  %2878 = vmatprep.mubr.bf16.mxu1 %v3242_v2 }
 0x67a   : > { %2947 = vmatprep.mubr.bf16.mxu0 %v3242_v2 }
 0x67f   : > { %3175 = vmatmul.mubr.msk.bf16.vlgmr.msra.gmra.mxu1 %vm698_vm0, %v3232_v8 }
 0x680   : > { %3180 = vmatmul.mubr.msk.bf16.vlgmr.msra.gmra.mxu0 %vm698_vm0, %v3233_v18  ;;  %v2967_v51 = vpop.permute.xlu0 %2966 }
 0x71f   : > { %v2432_v19 = vpop.f32.mrf.mxu1 }
 0x721   : > { %v2434_v54 = vpop.f32.mrf.mxu1 }
 0x723   : > { %v2436_v55 = vpop.f32.mrf.mxu1 }
 0x725   : > { %v2438_v56 = vpop.f32.mrf.mxu1 }
 0x727   : > { %v2483_v57 = vpop.f32.mrf.mxu1 }
 0x728   : > { %v2548_v58 = vpop.f32.mrf.mxu0  ;;  %v2484_v63 = vadd.f32 %v2483_v57, %v2432_v19 }
 0x729   : > { %v2485_v7 = vpop.f32.mrf.mxu1 }
 0x72a   : > { %v2550_v2 = vpop.f32.mrf.mxu0  ;;  %v2486_v1 = vadd.f32 %v2485_v7, %v2434_v54  ;;  %v2557_v9 = vadd.f32 %v2548_v58, %v2484_v63  ;;  %v2972_v58 = vpop.permute.xlu1 %2971 }
 0x72b   : > { %v2487_v13 = vpop.f32.mrf.mxu1 }
 0x72c   : > { %v2552_v14 = vpop.f32.mrf.mxu0  ;;  %v2488_v11 = vadd.f32 %v2487_v13, %v2436_v55  ;;  %v2558_v16 = vadd.f32 %v2550_v2, %v2486_v1 }
 0x72d   : > { %v2489_v60 = vpop.f32.mrf.mxu1 }
 0x72e   : > { %v2554_v62 = vpop.f32.mrf.mxu0  ;;  %v2490_v17 = vadd.f32 %v2489_v60, %v2438_v56  ;;  %v2559_v21 = vadd.f32 %v2552_v14, %v2488_v11 }
 0x72f   : > { %v2617_v0 = vpop.f32.mrf.mxu1 }
 0x730   : > { %v2675_v3 = vpop.f32.mrf.mxu0  ;;  %v2626_v20 = vadd.f32 %v2617_v0, %v2557_v9  ;;  %v2560_v49 = vadd.f32 %v2554_v62, %v2490_v17 }
 0x731   : > { %v2619_v4 = vpop.f32.mrf.mxu1 }
 0x732   : > { %v2677_v12 = vpop.f32.mrf.mxu0  ;;  %v2627_v22 = vadd.f32 %v2619_v4, %v2558_v16  ;;  %v2684_v10 = vadd.f32 %v2675_v3, %v2626_v20 }
 0x733   : > { %v2621_v15 = vpop.f32.mrf.mxu1 }
 0x734   : > { %v2679_v38 = vpop.f32.mrf.mxu0  ;;  %v2628_v24 = vadd.f32 %v2621_v15, %v2559_v21  ;;  %v2685_v27 = vadd.f32 %v2677_v12, %v2627_v22 }
 0x735   : > { %v2623_v41 = vpop.f32.mrf.mxu1 }
 0x736   : > { %v2681_v45 = vpop.f32.mrf.mxu0  ;;  %v2629_v28 = vadd.f32 %v2623_v41, %v2560_v49  ;;  %v2686_v32 = vadd.f32 %v2679_v38, %v2628_v24 }
 0x737   : > { %v2744_v23 = vpop.f32.mrf.mxu1 }
 0x738   : > { %v2813_v25 = vpop.f32.mrf.mxu0  ;;  %v2753_v29 = vadd.f32 %v2744_v23, %v2684_v10  ;;  %v2687_v36 = vadd.f32 %v2681_v45, %v2629_v28 }
 0x739   : > { %v2746_v26 = vpop.f32.mrf.mxu1 }
 0x73a   : > { %v2815_v30 = vpop.f32.mrf.mxu0  ;;  %v2754_v33 = vadd.f32 %v2746_v26, %v2685_v27  ;;  %v2822_v37 = vadd.f32 %v2813_v25, %v2753_v29 }
 0x73b   : > { %v2748_v31 = vpop.f32.mrf.mxu1 }
 0x73c   : > { %v2817_v34 = vpop.f32.mrf.mxu0  ;;  %v2755_v39 = vadd.f32 %v2748_v31, %v2686_v32  ;;  %v2823_v43 = vadd.f32 %v2815_v30, %v2754_v33 }
 0x73d   : > { %v2750_v35 = vpop.f32.mrf.mxu1 }
 0x73e   : > { %v2819_v40 = vpop.f32.mrf.mxu0  ;;  %v2756_v44 = vadd.f32 %v2750_v35, %v2687_v36  ;;  %v2824_v5 = vadd.f32 %v2817_v34, %v2755_v39 }
 0x73f   : > { %v2880_v42 = vpop.f32.mrf.mxu1 }
 0x740   : > { %v2889_v46 = vadd.f32 %v2880_v42, %v2822_v37  ;;  %v2949_v47 = vpop.f32.mrf.mxu0  ;;  %v2825_v61 = vadd.f32 %v2819_v40, %v2756_v44 }
 0x741   : > { %v2882_v48 = vpop.f32.mrf.mxu1 }
 0x742   : > { %v2958_v6 = vadd.f32 %v2949_v47, %v2889_v46  ;;  %v2890_v50 = vadd.f32 %v2882_v48, %v2823_v43  ;;  %v2951_v59 = vpop.f32.mrf.mxu0 }
 0x743   : > { %v2884_v52 = vpop.f32.mrf.mxu1 }
 0x744   : > { %v2974_v53 = vadd.f32 %v2967_v51, %v2958_v6  ;;  %v2959_v8 = vadd.f32 %v2951_v59, %v2890_v50  ;;  %v2891_v18 = vadd.f32 %v2884_v52, %v2824_v5  ;;  %v2953_v19 = vpop.f32.mrf.mxu0 }
 0x745   : > { %v2886_v54 = vpop.f32.mrf.mxu1 }
 0x746   : > { %2978 = vst [vmem:[%s602_s4] sm:$0xff] %v2974_v53  ;;  %v2975_v55 = vadd.f32 %v2967_v51, %v2959_v8  ;;  %v2960_v56 = vadd.f32 %v2953_v19, %v2891_v18  ;;  %v2892_v57 = vadd.f32 %v2886_v54, %v2825_v61  ;;  %v2955_v7 = vpop.f32.mrf.mxu0 }
 0x748   : > { %2979 = vst [vmem:[%s602_s4 + $0x8] sm:$0xff] %v2975_v55  ;;  %v2976_v2 = vadd.f32 %v2972_v58, %v2960_v56  ;;  %v2961_v13 = vadd.f32 %v2955_v7, %v2892_v57 }
 0x74a   : > { %2980 = vst [vmem:[%s602_s4 + $0x10] sm:$0xff] %v2976_v2  ;;  %v2977_v14 = vadd.f32 %v2972_v58, %v2961_v13 }
 0x74c   : > { %2981 = vst [vmem:[%s602_s4 + $0x18] sm:$0xff] %v2977_v14 }
 0x74d PF: > { %s29_s0 = sadd.s32 1, %s3240_s0  }
 0x74e   : > { %p26_p4 = scmp.ge.s32.totalorder %s29_s0, 4  }
 0x750   :  { %28 = sbr.rel (!%p26_p4) target bundleno = 10 (0xa), region = 150 }

</bundles_post_ra>
